<compile_context>
chip_gen: v6e
topology: v6e:2x2x1
jax: 0.10.0
libtpu: 0.0.40
codegen_flags: <defaults>
</compile_context>

<pallas_src>
import math
import functools

import jax
import jax.numpy as jnp
from jax.experimental import pallas as pl
from jax.experimental.pallas import tpu as pltpu

CONV_KERNEL_SIZE = 4
CONV_PADDING = 3
EPSILON = 1e-9
RMS_EPS = float(jnp.finfo(jnp.float32).eps)   # nn.RMSNorm(eps=None) -> finfo eps
LN_EPS = 1e-5                                 # nn.LayerNorm default eps


# ----------------------------------------------------------------------------
# generation-aware VMEM / tiling heuristics
# ----------------------------------------------------------------------------
def _vmem_limit_bytes():
    cap = 64 * 1024 * 1024
    try:
        info = pltpu.get_tpu_info()
        c = getattr(info, "vmem_capacity_bytes", None)
        if c:
            cap = int(c)
    except Exception:
        pass
    # ~3/4 of physical: ~48 MiB on v7x, ~96 MiB on v5e/v6e.
    return int(min(cap * 3 // 4, 100 * 1024 * 1024))


_VMEM_LIMIT = _vmem_limit_bytes()
_ROW_TILE_MAX = 1024 if _VMEM_LIMIT >= 80 * 1024 * 1024 else 512


def _row_tile(n):
    """Largest row tile dividing n (prefer >=2 grid steps for pipelining)."""
    for t in (1024, 512, 256, 128, 64, 32, 16, 8):
        if t <= _ROW_TILE_MAX and n % t == 0 and n // t >= 2:
            return t
    return n


def _batch_block(b):
    # keep >=2 batch grid steps so both v7x TensorCores get work.
    if b >= 16 and b % 8 == 0:
        return 8
    return 1


def _ff_tile(ff, max_tile=2048):
    if ff <= max_tile:
        return ff
    for t in range(max_tile, 127, -128):
        if ff % t == 0:
            return t
    return ff


def _chunks_per_super(n_chunks, chunk_size, target_rows=1024):
    cap = max(1, target_rows // max(chunk_size, 1))
    best = 1
    for d in range(1, n_chunks + 1):
        if n_chunks % d == 0 and d <= cap:
            best = d
    return best


def _gelu_exact(x):
    return 0.5 * x * (1.0 + jax.lax.erf(x * 0.7071067811865475))


# ----------------------------------------------------------------------------
# Kernel 1: RMSNorm1 + K/V projection + low-rank delta/eta/alpha (both stages)
# ----------------------------------------------------------------------------
def _make_proj_kernel(H):
    def kernel(x_ref, n1_ref, wkv_ref, wlr_ref, wlr2_ref, kv_ref, dea_ref):
        x = x_ref[...]                                        # (T, D) f32
        ms = jnp.mean(x * x, axis=-1, keepdims=True)
        xn = x * jax.lax.rsqrt(ms + RMS_EPS) * n1_ref[...]
        xnb = xn.astype(jnp.bfloat16)

        kv_ref[...] = jnp.dot(xnb, wkv_ref[...],
                              preferred_element_type=jnp.float32)
        lr = jnp.dot(xnb, wlr_ref[...], preferred_element_type=jnp.float32)
        y2 = jnp.dot(lr.astype(jnp.bfloat16), wlr2_ref[...],
                     preferred_element_type=jnp.float32)       # (T, 3H)

        # columns of y2: [delta | eta | alpha] -> apply each activation on its
        # own half (no doubled transcendental work on the single EUP slot).
        delta = jax.nn.softplus(y2[:, :H])
        eta = jax.nn.softplus(y2[:, H:2 * H])
        alpha = jax.nn.sigmoid(y2[:, 2 * H:])
        dea_ref[...] = jnp.concatenate([delta, eta, alpha], axis=-1)
    return kernel


def fused_proj(x2d, w, H):
    N, D = x2d.shape
    LR3 = w['wlr'].shape[1]
    T = _row_tile(N)
    row = lambda i: (i, 0)
    fixed = lambda i: (0, 0)
    # TODO(synk): mark constant-index weight specs pipeline_mode=pl.Buffered(1)
    # once single-buffered pallas_call inputs are confirmed on the target JAX.
    return pl.pallas_call(
        _make_proj_kernel(H),
        out_shape=(jax.ShapeDtypeStruct((N, 2 * H), jnp.float32),   # [k | v]
                   jax.ShapeDtypeStruct((N, 3 * H), jnp.float32)),  # [d | e | a]
        grid=(N // T,),
        in_specs=[pl.BlockSpec((T, D), row),
                  pl.BlockSpec((1, D), fixed),
                  pl.BlockSpec((D, 2 * H), fixed),
                  pl.BlockSpec((D, LR3), fixed),
                  pl.BlockSpec((LR3, 3 * H), fixed)],
        out_specs=(pl.BlockSpec((T, 2 * H), row),
                   pl.BlockSpec((T, 3 * H), row)),
        compiler_params=pltpu.CompilerParams(
            dimension_semantics=("parallel",),
            vmem_limit_bytes=_VMEM_LIMIT),
    )(x2d, w['norm1'], w['wkv'], w['wlr'], w['wlr2'])


# ----------------------------------------------------------------------------
# Kernel 2: depthwise causal conv over [k|v] (2H lanes) + key LayerNorm.
# Causal halo handled in-kernel (roll + row mask) -- no host-side pad pass.
# ----------------------------------------------------------------------------
def _make_conv_ln_kernel(S, H):
    C2 = 2 * H

    def kernel(x_ref, w_ref, b_ref, g_ref, beta_ref, o_ref):
        x = x_ref[0]                             # (S, 2H) f32
        w = w_ref[...]                           # (K, 2H)
        row = jax.lax.broadcasted_iota(jnp.int32, (S, C2), 0)

        y = x * w[CONV_KERNEL_SIZE - 1:CONV_KERNEL_SIZE, :]     # tap 3, shift 0
        for kk in range(CONV_KERNEL_SIZE - 1):                  # taps 0..2
            shift = CONV_PADDING - kk                           # 3, 2, 1
            xs = pltpu.roll(x, shift=shift, axis=0)             # XLU rotate
            xs = jnp.where(row >= shift, xs, 0.0)               # causal zeros
            y = y + xs * w[kk:kk + 1, :]
        y = y + b_ref[...]                                       # (1, 2H)

        kpart = y[:, :H]
        vpart = y[:, H:]
        mu = jnp.mean(kpart, axis=-1, keepdims=True)
        kc = kpart - mu
        var = jnp.mean(kc * kc, axis=-1, keepdims=True)
        k_ln = kc * jax.lax.rsqrt(var + LN_EPS) * g_ref[...] + beta_ref[...]
        o_ref[...] = jnp.concatenate([k_ln, vpart], axis=-1)[None]
    return kernel


def conv_ln(kv, w, H):
    B, S, C2 = kv.shape
    # TODO(synk): for very long S, also tile the seq axis with a halo block to
    # bound VMEM; per-batch blocks are fine at these sizes.
    return pl.pallas_call(
        _make_conv_ln_kernel(S, H),
        out_shape=jax.ShapeDtypeStruct((B, S, C2), jnp.float32),   # [k_ln | v]
        grid=(B,),
        in_specs=[pl.BlockSpec((1, S, C2), lambda b: (b, 0, 0)),
                  pl.BlockSpec((CONV_KERNEL_SIZE, C2), lambda b: (0, 0)),
                  pl.BlockSpec((1, C2), lambda b: (0, 0)),
                  pl.BlockSpec((1, H), lambda b: (0, 0)),
                  pl.BlockSpec((1, H), lambda b: (0, 0))],
        out_specs=pl.BlockSpec((1, S, C2), lambda b: (b, 0, 0)),
        compiler_params=pltpu.CompilerParams(
            dimension_semantics=("parallel",),
            vmem_limit_bytes=_VMEM_LIMIT),
    )(kv, w['conv_w'], w['conv_b'], w['kn_w'], w['kn_b'])


# ----------------------------------------------------------------------------
# Kernel 3: chunked memory recurrence (training-mode update path).
# grid = (batch_blocks, n_super); the chunk loop runs INSIDE the kernel over a
# resident super-chunk block; per-batch weight state lives in VMEM scratch.
# ----------------------------------------------------------------------------
def _make_memory_kernel(H, chunk, n_inner):
    def kernel(kv_ref, dea_ref, w1_ref, b1_ref, w2_ref, b2_ref,
               out_ref, w1_s, b1_s, w2_s, b2_s):
        @pl.when(pl.program_id(1) == 0)
        def _():
            w1_s[...] = jnp.broadcast_to(w1_ref[...][None], w1_s.shape)
            b1_s[...] = jnp.broadcast_to(b1_ref[...], b1_s.shape)
            w2_s[...] = jnp.broadcast_to(w2_ref[...][None], w2_s.shape)
            b2_s[...] = jnp.broadcast_to(b2_ref[...], b2_s.shape)

        for c in range(n_inner):
            lo = c * chunk
            kvc = kv_ref[:, lo:lo + chunk, :]        # (bb, C, 2H)
            deac = dea_ref[:, lo:lo + chunk, :]      # (bb, C, 3H)
            k = kvc[..., :H]
            v = kvc[..., H:]
            delta = deac[..., :H]
            eta_last = deac[:, chunk - 1, H:2 * H]   # (bb, H)
            alpha_last = deac[:, chunk - 1, 2 * H:]  # (bb, H)

            w1 = w1_s[...]; b1 = b1_s[...]; w2 = w2_s[...]; b2 = b2_s[...]

            # _forward_memory (return_intermediate=True) with pre-update state
            inter = jnp.einsum('bch,bmh->bcm', k, w1,
                               preferred_element_type=jnp.float32) + b1[:, None, :]
            act = _gelu_exact(inter)
            mem_out = jnp.einsum('bcm,bhm->bch', act, w2,
                                 preferred_element_type=jnp.float32) + b2[:, None, :]
            out_ref[:, lo:lo + chunk, :] = mem_out

            # _update_memory_state (exact reciprocal: error compounds through
            # the recurrence, so no approx EUP rcp here)
            error = mem_out - v
            error_norm = jnp.sqrt(jnp.sum(error * error, axis=-1, keepdims=True))
            l1_grad = delta * (error / (error_norm + EPSILON))
            pred_grad = jnp.where(error_norm > delta, l1_grad, error)

            alpha_w = jnp.mean(alpha_last, axis=-1, keepdims=True)[:, :, None]
            eta_w = jnp.mean(eta_last, axis=-1, keepdims=True)[:, :, None]
            upd = jnp.mean(pred_grad, axis=1)              # (bb, H)
            act_mean = jnp.mean(act, axis=1)               # (bb, M)

            w1_grad = act_mean[:, :, None] * upd[:, None, :]    # (bb, M, H)
            w2_grad = upd[:, :, None] * act_mean[:, None, :]    # (bb, H, M)
            new_w1 = alpha_w * w1 - eta_w * w1_grad
            new_w2 = alpha_w * w2 - eta_w * w2_grad

            b2_upd = upd
            b1_upd = jnp.mean(jnp.einsum('bch,bhm->bcm', pred_grad, new_w2,
                                         preferred_element_type=jnp.float32),
                              axis=1)                           # (bb, M)
            new_b2 = alpha_last * b2 - eta_last * b2_upd
            new_b1 = (jnp.mean(alpha_last, axis=-1, keepdims=True) * b1
                      - jnp.mean(eta_last, axis=-1, keepdims=True) * b1_upd)

            w1_s[...] = new_w1
            w2_s[...] = new_w2
            b1_s[...] = new_b1
            b2_s[...] = new_b2
    return kernel


def run_memory(klnv, dea, w, chunk_size):
    B, S, C2 = klnv.shape
    H = C2 // 2
    M = w['mem_w1'].shape[0]
    assert S % chunk_size == 0, "sequence length must divide the chunk size"
    n_chunks = S // chunk_size
    cps = _chunks_per_super(n_chunks, chunk_size)
    n_super = n_chunks // cps
    sup = cps * chunk_size
    bb = _batch_block(B)
    assert B % bb == 0

    kv_spec = pl.BlockSpec((bb, sup, 2 * H), lambda b, s: (b, s, 0))
    dea_spec = pl.BlockSpec((bb, sup, 3 * H), lambda b, s: (b, s, 0))
    out_spec = pl.BlockSpec((bb, sup, H), lambda b, s: (b, s, 0))
    fixed2 = lambda b, s: (0, 0)
    return pl.pallas_call(
        _make_memory_kernel(H, chunk_size, cps),
        out_shape=jax.ShapeDtypeStruct((B, S, H), jnp.float32),
        grid=(B // bb, n_super),
        in_specs=[kv_spec, dea_spec,
                  pl.BlockSpec((M, H), fixed2),
                  pl.BlockSpec((1, M), fixed2),
                  pl.BlockSpec((H, M), fixed2),
                  pl.BlockSpec((1, H), fixed2)],
        out_specs=out_spec,
        scratch_shapes=[
            pltpu.VMEM((bb, M, H), jnp.float32),
            pltpu.VMEM((bb, M), jnp.float32),
            pltpu.VMEM((bb, H, M), jnp.float32),
            pltpu.VMEM((bb, H), jnp.float32),
        ],
        compiler_params=pltpu.CompilerParams(
            dimension_semantics=("parallel", "arbitrary"),
            vmem_limit_bytes=_VMEM_LIMIT),
    )(klnv, dea, w['mem_w1'], w['mem_b1'], w['mem_w2'], w['mem_b2'])


# ----------------------------------------------------------------------------
# Kernel 4: epilogue with ff-tiled GatedMLP contraction
#   attn = x + sigmoid(gate_proj(rmsnorm1(x))) * (mem @ Wo)
#   out  = attn + GatedMLP(rmsnorm2(attn))
# ----------------------------------------------------------------------------
def _epilogue_kernel(x_ref, mem_ref, n1_ref, wg_ref, wo_ref, n2_ref,
                     wmg_ref, wmu_ref, wmo_ref, out_ref, attn_s, acc_s):
    f = pl.program_id(1)

    @pl.when(f == 0)
    def _():
        x = x_ref[...]                                        # (T, D) f32
        ms = jnp.mean(x * x, axis=-1, keepdims=True)
        xn = x * jax.lax.rsqrt(ms + RMS_EPS) * n1_ref[...]
        gate = jax.nn.sigmoid(jnp.dot(xn.astype(jnp.bfloat16), wg_ref[...],
                                      preferred_element_type=jnp.float32))
        proj = jnp.dot(mem_ref[...].astype(jnp.bfloat16), wo_ref[...],
                       preferred_element_type=jnp.float32)
        attn_s[...] = x + proj * gate
        acc_s[...] = jnp.zeros_like(acc_s)

    attn = attn_s[...]
    ms2 = jnp.mean(attn * attn, axis=-1, keepdims=True)
    an = (attn * jax.lax.rsqrt(ms2 + RMS_EPS) * n2_ref[...]).astype(jnp.bfloat16)
    g = jnp.dot(an, wmg_ref[...], preferred_element_type=jnp.float32)
    u = jnp.dot(an, wmu_ref[...], preferred_element_type=jnp.float32)
    h = (jax.nn.silu(g) * u).astype(jnp.bfloat16)
    acc_s[...] += jnp.dot(h, wmo_ref[...], preferred_element_type=jnp.float32)

    @pl.when(f == pl.num_programs(1) - 1)
    def _():
        out_ref[...] = attn_s[...] + acc_s[...]


def epilogue(x2d, mem2d, w):
    N, D = x2d.shape
    H = mem2d.shape[1]
    ff = w['mlp_gate'].shape[1]
    T = _row_tile(N)
    tf = _ff_tile(ff)
    n_ff = ff // tf
    row = lambda i, f: (i, 0)
    fixed = lambda i, f: (0, 0)
    return pl.pallas_call(
        _epilogue_kernel,
        out_shape=jax.ShapeDtypeStruct((N, D), jnp.float32),
        grid=(N // T, n_ff),
        in_specs=[pl.BlockSpec((T, D), row),
                  pl.BlockSpec((T, H), row),
                  pl.BlockSpec((1, D), fixed),
                  pl.BlockSpec((D, D), fixed),
                  pl.BlockSpec((H, D), fixed),
                  pl.BlockSpec((1, D), fixed),
                  pl.BlockSpec((D, tf), lambda i, f: (0, f)),
                  pl.BlockSpec((D, tf), lambda i, f: (0, f)),
                  pl.BlockSpec((tf, D), lambda i, f: (f, 0))],
        out_specs=pl.BlockSpec((T, D), row),
        scratch_shapes=[pltpu.VMEM((T, D), jnp.float32),
                        pltpu.VMEM((T, D), jnp.float32)],
        compiler_params=pltpu.CompilerParams(
            dimension_semantics=("parallel", "arbitrary"),
            vmem_limit_bytes=_VMEM_LIMIT),
    )(x2d, mem2d, w['norm1'], w['wgate'], w['wo'], w['norm2'],
      w['mlp_gate'], w['mlp_up'], w['mlp_out'])


# ----------------------------------------------------------------------------
# Parameter init (deterministic, shapes per the module __init__) + fused prep
# ----------------------------------------------------------------------------
def init_params(seed, D, H, state_dim, ff, low_rank, expansion):
    M = state_dim * expansion
    keys = iter(jax.random.split(jax.random.PRNGKey(seed), 32))

    def lin(out_dim, in_dim):
        bound = 1.0 / math.sqrt(in_dim)
        return jax.random.uniform(next(keys), (out_dim, in_dim), jnp.float32,
                                  -bound, bound)

    p = {}
    p['wq'] = lin(H, D); p['wk'] = lin(H, D); p['wv'] = lin(H, D)
    p['wo'] = lin(D, H); p['wgate'] = lin(D, D)
    p['eta_a'] = lin(low_rank, D);   p['eta_b'] = lin(H, low_rank)
    p['delta_a'] = lin(low_rank, D); p['delta_b'] = lin(H, low_rank)
    p['alpha_a'] = lin(low_rank, D); p['alpha_b'] = lin(H, low_rank)
    cb = 1.0 / math.sqrt(CONV_KERNEL_SIZE)
    p['conv_w'] = jax.random.uniform(next(keys), (CONV_KERNEL_SIZE, H),
                                     jnp.float32, -cb, cb)
    p['conv_b'] = jax.random.uniform(next(keys), (H,), jnp.float32, -cb, cb)
    p['kn_w'] = jnp.ones((H,), jnp.float32); p['kn_b'] = jnp.zeros((H,), jnp.float32)
    mb1 = 1.0 / math.sqrt(H)
    p['mem_w1'] = jax.random.uniform(next(keys), (M, H), jnp.float32, -mb1, mb1)
    p['mem_b1'] = jax.random.uniform(next(keys), (M,), jnp.float32, -mb1, mb1)
    mb2 = 1.0 / math.sqrt(M)
    p['mem_w2'] = jax.random.uniform(next(keys), (H, M), jnp.float32, -mb2, mb2)
    p['mem_b2'] = jax.random.uniform(next(keys), (H,), jnp.float32, -mb2, mb2)
    p['mlp_gate'] = lin(ff, D); p['mlp_up'] = lin(ff, D); p['mlp_out'] = lin(D, ff)
    p['norm1_w'] = jnp.ones((D,), jnp.float32)
    p['norm2_w'] = jnp.ones((D,), jnp.float32)
    return p


def prepare_params(p):
    """One-time fusion / transpose / bf16 cast of weights (no per-forward .T)."""
    bf = jnp.bfloat16
    H = p['wk'].shape[0]
    LR = p['eta_a'].shape[0]
    w = {}
    w['norm1'] = p['norm1_w'].reshape(1, -1)
    w['norm2'] = p['norm2_w'].reshape(1, -1)
    # fused K/V projection -> (D, 2H)
    w['wkv'] = jnp.concatenate([p['wk'].T, p['wv'].T], axis=1).astype(bf)
    # fused low-rank stage 1, columns [delta | eta | alpha] -> (D, 3*LR)
    w['wlr'] = jnp.concatenate([p['delta_a'].T, p['eta_a'].T, p['alpha_a'].T],
                               axis=1).astype(bf)
    # block-diagonal stage 2 -> (3*LR, 3*H), cols [delta | eta | alpha]
    wlr2 = jnp.zeros((3 * LR, 3 * H), jnp.float32)
    wlr2 = wlr2.at[0:LR, 0:H].set(p['delta_b'].T)
    wlr2 = wlr2.at[LR:2 * LR, H:2 * H].set(p['eta_b'].T)
    wlr2 = wlr2.at[2 * LR:, 2 * H:].set(p['alpha_b'].T)
    w['wlr2'] = wlr2.astype(bf)
    # shared depthwise conv applied to both the k and v lanes
    w['conv_w'] = jnp.concatenate([p['conv_w'], p['conv_w']], axis=1)     # (K, 2H)
    w['conv_b'] = jnp.concatenate([p['conv_b'], p['conv_b']]).reshape(1, -1)
    w['kn_w'] = p['kn_w'].reshape(1, -1)
    w['kn_b'] = p['kn_b'].reshape(1, -1)
    w['mem_w1'] = p['mem_w1']
    w['mem_b1'] = p['mem_b1'].reshape(1, -1)
    w['mem_w2'] = p['mem_w2']
    w['mem_b2'] = p['mem_b2'].reshape(1, -1)
    w['wo'] = p['wo'].T.astype(bf)               # (H, D)
    w['wgate'] = p['wgate'].T.astype(bf)         # (D, D)
    w['mlp_gate'] = p['mlp_gate'].T.astype(bf)   # (D, ff)
    w['mlp_up'] = p['mlp_up'].T.astype(bf)       # (D, ff)
    w['mlp_out'] = p['mlp_out'].T.astype(bf)     # (ff, D)
    return w


# ----------------------------------------------------------------------------
# Full YAADBlock forward
# ----------------------------------------------------------------------------
def yaad_block_forward(x, w, chunk_size=8):
    B, S, D = x.shape
    H = w['mem_w2'].shape[0]
    N = B * S
    x2d = x.reshape(N, D)

    # dead query path (query projection / conv / query_norm) is skipped — its
    # result is never consumed in the reference forward.
    kv2d, dea2d = fused_proj(x2d, w, H)

    klnv = conv_ln(kv2d.reshape(B, S, 2 * H), w, H)          # [k_ln | v]
    mem = run_memory(klnv, dea2d.reshape(B, S, 3 * H), w, chunk_size)

    out2d = epilogue(x2d, mem.reshape(N, H), w)
    return out2d.reshape(B, S, D)


if __name__ == "__main__":
    B, S, D = 2, 16, 32
    H, state_dim, ff, low_rank, expansion = 16, 8, 64, 8, 2
    chunk_size = 8   # -> 2 chunks, exercises the memory-update recurrence

    raw = init_params(1, D, H, state_dim, ff, low_rank, expansion)
    params = prepare_params(raw)
    x = jax.random.normal(jax.random.PRNGKey(0), (B, S, D), jnp.float32)

    fwd = jax.jit(functools.partial(yaad_block_forward, chunk_size=chunk_size))
    out = fwd(x, params)
    jax.block_until_ready(out)
    assert out.shape == (B, S, D)
    assert bool(jnp.all(jnp.isfinite(out)))
    print("KERNEL_OK")
</pallas_src>

<mosaic_0001>
module attributes {stable_mosaic.version = 11 : i64} {
  func.func @kernel(%arg0: i32, %arg1: memref<1x16x32xf32, #tpu.memory_space<vmem>>, %arg2: memref<4x32xf32, #tpu.memory_space<vmem>>, %arg3: memref<1x32xf32, #tpu.memory_space<vmem>>, %arg4: memref<1x16xf32, #tpu.memory_space<vmem>>, %arg5: memref<1x16xf32, #tpu.memory_space<vmem>>, %arg6: memref<1x16x32xf32, #tpu.memory_space<vmem>>) attributes {dimension_semantics = [#tpu.dimension_semantics<parallel>], iteration_bounds = array<i64: 2>, scalar_prefetch = 0 : i64, scratch_operands = 0 : i64, tpu.core_type = #tpu.core_type<tc>, window_params = [{transform_indices = @transform_0, window_bounds = array<i64: 1, 16, 32>}, {pipeline_mode = #tpu.pipeline_mode<synchronous>, transform_indices = @transform_1, window_bounds = array<i64: 4, 32>}, {pipeline_mode = #tpu.pipeline_mode<synchronous>, transform_indices = @transform_2, window_bounds = array<i64: 1, 32>}, {pipeline_mode = #tpu.pipeline_mode<synchronous>, transform_indices = @transform_3, window_bounds = array<i64: 1, 16>}, {pipeline_mode = #tpu.pipeline_mode<synchronous>, transform_indices = @transform_4, window_bounds = array<i64: 1, 16>}, {transform_indices = @transform_5, window_bounds = array<i64: 1, 16, 32>}]} {
    %c0 = arith.constant 0 : index
    %c0_0 = arith.constant 0 : index
    %c0_1 = arith.constant 0 : index
    %0 = vector.load %arg1[%c0, %c0_0, %c0_1] : memref<1x16x32xf32, #tpu.memory_space<vmem>>, vector<1x16x32xf32>
    %1 = vector.shape_cast %0 : vector<1x16x32xf32> to vector<16x32xf32>
    %c0_2 = arith.constant 0 : index
    %c0_3 = arith.constant 0 : index
    %2 = vector.load %arg2[%c0_2, %c0_3] : memref<4x32xf32, #tpu.memory_space<vmem>>, vector<4x32xf32>
    %3 = tpu.iota {dimensions = array<i32: 0>} : vector<16x32xi32>
    %4 = vector.extract_strided_slice %2 {offsets = [3, 0], sizes = [1, 32], strides = [1, 1]} : vector<4x32xf32> to vector<1x32xf32>
    %5 = vector.broadcast %4 : vector<1x32xf32> to vector<16x32xf32>
    %6 = arith.mulf %1, %5 : vector<16x32xf32>
    %c3_i32 = arith.constant 3 : i32
    %7 = tpu.dynamic_rotate %1 by %c3_i32 dim 0 : vector<16x32xf32>, i32 -> vector<16x32xf32>
    %c3_i32_4 = arith.constant 3 : i32
    %8 = vector.broadcast %c3_i32_4 : i32 to vector<16x32xi32>
    %9 = arith.cmpi sge, %3, %8 : vector<16x32xi32>
    %cst = arith.constant 0.000000e+00 : f32
    %10 = vector.broadcast %cst : f32 to vector<16x32xf32>
    %11 = arith.select %9, %7, %10 : vector<16x32xi1>, vector<16x32xf32>
    %12 = vector.extract_strided_slice %2 {offsets = [0, 0], sizes = [1, 32], strides = [1, 1]} : vector<4x32xf32> to vector<1x32xf32>
    %13 = vector.broadcast %12 : vector<1x32xf32> to vector<16x32xf32>
    %14 = arith.mulf %11, %13 : vector<16x32xf32>
    %15 = arith.addf %6, %14 : vector<16x32xf32>
    %c2_i32 = arith.constant 2 : i32
    %16 = tpu.dynamic_rotate %1 by %c2_i32 dim 0 : vector<16x32xf32>, i32 -> vector<16x32xf32>
    %c2_i32_5 = arith.constant 2 : i32
    %17 = vector.broadcast %c2_i32_5 : i32 to vector<16x32xi32>
    %18 = arith.cmpi sge, %3, %17 : vector<16x32xi32>
    %cst_6 = arith.constant 0.000000e+00 : f32
    %19 = vector.broadcast %cst_6 : f32 to vector<16x32xf32>
    %20 = arith.select %18, %16, %19 : vector<16x32xi1>, vector<16x32xf32>
    %21 = vector.extract_strided_slice %2 {offsets = [1, 0], sizes = [1, 32], strides = [1, 1]} : vector<4x32xf32> to vector<1x32xf32>
    %22 = vector.broadcast %21 : vector<1x32xf32> to vector<16x32xf32>
    %23 = arith.mulf %20, %22 : vector<16x32xf32>
    %24 = arith.addf %15, %23 : vector<16x32xf32>
    %c1_i32 = arith.constant 1 : i32
    %25 = tpu.dynamic_rotate %1 by %c1_i32 dim 0 : vector<16x32xf32>, i32 -> vector<16x32xf32>
    %c1_i32_7 = arith.constant 1 : i32
    %26 = vector.broadcast %c1_i32_7 : i32 to vector<16x32xi32>
    %27 = arith.cmpi sge, %3, %26 : vector<16x32xi32>
    %cst_8 = arith.constant 0.000000e+00 : f32
    %28 = vector.broadcast %cst_8 : f32 to vector<16x32xf32>
    %29 = arith.select %27, %25, %28 : vector<16x32xi1>, vector<16x32xf32>
    %30 = vector.extract_strided_slice %2 {offsets = [2, 0], sizes = [1, 32], strides = [1, 1]} : vector<4x32xf32> to vector<1x32xf32>
    %31 = vector.broadcast %30 : vector<1x32xf32> to vector<16x32xf32>
    %32 = arith.mulf %29, %31 : vector<16x32xf32>
    %33 = arith.addf %24, %32 : vector<16x32xf32>
    %c0_9 = arith.constant 0 : index
    %c0_10 = arith.constant 0 : index
    %34 = vector.load %arg3[%c0_9, %c0_10] : memref<1x32xf32, #tpu.memory_space<vmem>>, vector<1x32xf32>
    %35 = vector.broadcast %34 : vector<1x32xf32> to vector<16x32xf32>
    %36 = arith.addf %33, %35 : vector<16x32xf32>
    %37 = vector.extract_strided_slice %36 {offsets = [0, 0], sizes = [16, 16], strides = [1, 1]} : vector<16x32xf32> to vector<16x16xf32>
    %38 = vector.extract_strided_slice %36 {offsets = [0, 16], sizes = [16, 16], strides = [1, 1]} : vector<16x32xf32> to vector<16x16xf32>
    %cst_11 = arith.constant dense<0.000000e+00> : vector<16xf32>
    %39 = vector.multi_reduction <add>, %37, %cst_11 [1] : vector<16x16xf32> to vector<16xf32>
    %40 = vector.shape_cast %39 : vector<16xf32> to vector<16x1xf32>
    %cst_12 = arith.constant 1.600000e+01 : f32
    %41 = vector.broadcast %cst_12 : f32 to vector<16x1xf32>
    %42 = arith.divf %40, %41 : vector<16x1xf32>
    %43 = vector.broadcast %42 : vector<16x1xf32> to vector<16x16xf32>
    %44 = arith.subf %37, %43 : vector<16x16xf32>
    %45 = arith.mulf %44, %44 : vector<16x16xf32>
    %cst_13 = arith.constant dense<0.000000e+00> : vector<16xf32>
    %46 = vector.multi_reduction <add>, %45, %cst_13 [1] : vector<16x16xf32> to vector<16xf32>
    %47 = vector.shape_cast %46 : vector<16xf32> to vector<16x1xf32>
    %cst_14 = arith.constant 1.600000e+01 : f32
    %48 = vector.broadcast %cst_14 : f32 to vector<16x1xf32>
    %49 = arith.divf %47, %48 : vector<16x1xf32>
    %cst_15 = arith.constant 9.99999974E-6 : f32
    %50 = vector.broadcast %cst_15 : f32 to vector<16x1xf32>
    %51 = arith.addf %49, %50 : vector<16x1xf32>
    %52 = math.rsqrt %51 : vector<16x1xf32>
    %53 = vector.broadcast %52 : vector<16x1xf32> to vector<16x16xf32>
    %54 = arith.mulf %44, %53 : vector<16x16xf32>
    %c0_16 = arith.constant 0 : index
    %c0_17 = arith.constant 0 : index
    %55 = vector.load %arg4[%c0_16, %c0_17] : memref<1x16xf32, #tpu.memory_space<vmem>>, vector<1x16xf32>
    %56 = vector.broadcast %55 : vector<1x16xf32> to vector<16x16xf32>
    %57 = arith.mulf %54, %56 : vector<16x16xf32>
    %c0_18 = arith.constant 0 : index
    %c0_19 = arith.constant 0 : index
    %58 = vector.load %arg5[%c0_18, %c0_19] : memref<1x16xf32, #tpu.memory_space<vmem>>, vector<1x16xf32>
    %59 = vector.broadcast %58 : vector<1x16xf32> to vector<16x16xf32>
    %60 = arith.addf %57, %59 : vector<16x16xf32>
    %61 = tpu.concatenate %60, %38 in 1 : vector<16x16xf32>, vector<16x16xf32> -> vector<16x32xf32>
    %62 = vector.shape_cast %61 : vector<16x32xf32> to vector<1x16x32xf32>
    %c0_20 = arith.constant 0 : index
    %c0_21 = arith.constant 0 : index
    %c0_22 = arith.constant 0 : index
    %63 = vector.load %arg6[%c0_20, %c0_21, %c0_22] : memref<1x16x32xf32, #tpu.memory_space<vmem>>, vector<1x16x32xf32>
    tpu.vector_store %arg6[%c0_20, %c0_21, %c0_22], %62 {strides = array<i32>} : memref<1x16x32xf32, #tpu.memory_space<vmem>>, vector<1x16x32xf32>,
    return
  }
  func.func @transform_0(%arg0: i32) -> (i32, i32, i32) {
    %c0_i32 = arith.constant 0 : i32
    %c0_i32_0 = arith.constant 0 : i32
    %c0_i32_1 = arith.constant 0 : i32
    return %arg0, %c0_i32, %c0_i32_0 : i32, i32, i32
  }
  func.func @transform_1(%arg0: i32) -> (i32, i32) {
    %c0_i32 = arith.constant 0 : i32
    %c0_i32_0 = arith.constant 0 : i32
    %c0_i32_1 = arith.constant 0 : i32
    return %c0_i32, %c0_i32_0 : i32, i32
  }
  func.func @transform_2(%arg0: i32) -> (i32, i32) {
    %c0_i32 = arith.constant 0 : i32
    %c0_i32_0 = arith.constant 0 : i32
    %c0_i32_1 = arith.constant 0 : i32
    return %c0_i32, %c0_i32_0 : i32, i32
  }
  func.func @transform_3(%arg0: i32) -> (i32, i32) {
    %c0_i32 = arith.constant 0 : i32
    %c0_i32_0 = arith.constant 0 : i32
    %c0_i32_1 = arith.constant 0 : i32
    return %c0_i32, %c0_i32_0 : i32, i32
  }
  func.func @transform_4(%arg0: i32) -> (i32, i32) {
    %c0_i32 = arith.constant 0 : i32
    %c0_i32_0 = arith.constant 0 : i32
    %c0_i32_1 = arith.constant 0 : i32
    return %c0_i32, %c0_i32_0 : i32, i32
  }
  func.func @transform_5(%arg0: i32) -> (i32, i32, i32) {
    %c0_i32 = arith.constant 0 : i32
    %c0_i32_0 = arith.constant 0 : i32
    %c0_i32_1 = arith.constant 0 : i32
    return %arg0, %c0_i32, %c0_i32_0 : i32, i32, i32
  }
}

module attributes {stable_mosaic.version = 11 : i64} {
  func.func @kernel(%arg0: i32, %arg1: i32, %arg2: memref<1x16x32xf32, #tpu.memory_space<vmem>>, %arg3: memref<1x16x48xf32, #tpu.memory_space<vmem>>, %arg4: memref<16x16xf32, #tpu.memory_space<vmem>>, %arg5: memref<1x16xf32, #tpu.memory_space<vmem>>, %arg6: memref<16x16xf32, #tpu.memory_space<vmem>>, %arg7: memref<1x16xf32, #tpu.memory_space<vmem>>, %arg8: memref<1x16x16xf32, #tpu.memory_space<vmem>>, %arg9: memref<1x16x16xf32, #tpu.memory_space<vmem>>, %arg10: memref<1x16xf32, #tpu.memory_space<vmem>>, %arg11: memref<1x16x16xf32, #tpu.memory_space<vmem>>, %arg12: memref<1x16xf32, #tpu.memory_space<vmem>>) attributes {dimension_semantics = [#tpu.dimension_semantics<parallel>, #tpu.dimension_semantics<arbitrary>], iteration_bounds = array<i64: 2, 1>, scalar_prefetch = 0 : i64, scratch_operands = 4 : i64, tpu.core_type = #tpu.core_type<tc>, window_params = [{transform_indices = @transform_0, window_bounds = array<i64: 1, 16, 32>}, {transform_indices = @transform_1, window_bounds = array<i64: 1, 16, 48>}, {pipeline_mode = #tpu.pipeline_mode<synchronous>, transform_indices = @transform_2, window_bounds = array<i64: 16, 16>}, {pipeline_mode = #tpu.pipeline_mode<synchronous>, transform_indices = @transform_3, window_bounds = array<i64: 1, 16>}, {pipeline_mode = #tpu.pipeline_mode<synchronous>, transform_indices = @transform_4, window_bounds = array<i64: 16, 16>}, {pipeline_mode = #tpu.pipeline_mode<synchronous>, transform_indices = @transform_5, window_bounds = array<i64: 1, 16>}, {transform_indices = @transform_6, window_bounds = array<i64: 1, 16, 16>}]} {
    %c0_i32 = arith.constant 0 : i32
    %0 = arith.cmpi eq, %arg1, %c0_i32 : i32
    %1 = arith.extui %0 : i1 to i32
    %c0_i32_0 = arith.constant 0 : i32
    %2 = arith.cmpi ne, %1, %c0_i32_0 : i32
    scf.if %2 {
      %c0_100 = arith.constant 0 : index
      %c0_101 = arith.constant 0 : index
      %209 = vector.load %arg4[%c0_100, %c0_101] : memref<16x16xf32, #tpu.memory_space<vmem>>, vector<16x16xf32>
      %210 = vector.shape_cast %209 : vector<16x16xf32> to vector<1x16x16xf32>
      %c0_102 = arith.constant 0 : index
      %c0_103 = arith.constant 0 : index
      %c0_104 = arith.constant 0 : index
      %211 = vector.load %arg9[%c0_102, %c0_103, %c0_104] : memref<1x16x16xf32, #tpu.memory_space<vmem>>, vector<1x16x16xf32>
      tpu.vector_store %arg9[%c0_102, %c0_103, %c0_104], %210 {strides = array<i32>} : memref<1x16x16xf32, #tpu.memory_space<vmem>>, vector<1x16x16xf32>,
      %c0_105 = arith.constant 0 : index
      %c0_106 = arith.constant 0 : index
      %212 = vector.load %arg5[%c0_105, %c0_106] : memref<1x16xf32, #tpu.memory_space<vmem>>, vector<1x16xf32>
      %c0_107 = arith.constant 0 : index
      %c0_108 = arith.constant 0 : index
      %213 = vector.load %arg10[%c0_107, %c0_108] : memref<1x16xf32, #tpu.memory_space<vmem>>, vector<1x16xf32>
      tpu.vector_store %arg10[%c0_107, %c0_108], %212 {strides = array<i32>} : memref<1x16xf32, #tpu.memory_space<vmem>>, vector<1x16xf32>,
      %c0_109 = arith.constant 0 : index
      %c0_110 = arith.constant 0 : index
      %214 = vector.load %arg6[%c0_109, %c0_110] : memref<16x16xf32, #tpu.memory_space<vmem>>, vector<16x16xf32>
      %215 = vector.shape_cast %214 : vector<16x16xf32> to vector<1x16x16xf32>
      %c0_111 = arith.constant 0 : index
      %c0_112 = arith.constant 0 : index
      %c0_113 = arith.constant 0 : index
      %216 = vector.load %arg11[%c0_111, %c0_112, %c0_113] : memref<1x16x16xf32, #tpu.memory_space<vmem>>, vector<1x16x16xf32>
      tpu.vector_store %arg11[%c0_111, %c0_112, %c0_113], %215 {strides = array<i32>} : memref<1x16x16xf32, #tpu.memory_space<vmem>>, vector<1x16x16xf32>,
      %c0_114 = arith.constant 0 : index
      %c0_115 = arith.constant 0 : index
      %217 = vector.load %arg7[%c0_114, %c0_115] : memref<1x16xf32, #tpu.memory_space<vmem>>, vector<1x16xf32>
      %c0_116 = arith.constant 0 : index
      %c0_117 = arith.constant 0 : index
      %218 = vector.load %arg12[%c0_116, %c0_117] : memref<1x16xf32, #tpu.memory_space<vmem>>, vector<1x16xf32>
      tpu.vector_store %arg12[%c0_116, %c0_117], %217 {strides = array<i32>} : memref<1x16xf32, #tpu.memory_space<vmem>>, vector<1x16xf32>,
    } else {
    }
    %c0 = arith.constant 0 : index
    %c0_1 = arith.constant 0 : index
    %c0_2 = arith.constant 0 : index
    %3 = vector.load %arg2[%c0, %c0_1, %c0_2] : memref<1x16x32xf32, #tpu.memory_space<vmem>>, vector<1x8x32xf32>
    %c0_3 = arith.constant 0 : index
    %c0_4 = arith.constant 0 : index
    %c0_5 = arith.constant 0 : index
    %4 = vector.load %arg3[%c0_3, %c0_4, %c0_5] : memref<1x16x48xf32, #tpu.memory_space<vmem>>, vector<1x8x48xf32>
    %5 = vector.extract_strided_slice %3 {offsets = [0, 0, 0], sizes = [1, 8, 16], strides = [1, 1, 1]} : vector<1x8x32xf32> to vector<1x8x16xf32>
    %6 = vector.extract_strided_slice %3 {offsets = [0, 0, 16], sizes = [1, 8, 16], strides = [1, 1, 1]} : vector<1x8x32xf32> to vector<1x8x16xf32>
    %7 = vector.extract_strided_slice %4 {offsets = [0, 0, 0], sizes = [1, 8, 16], strides = [1, 1, 1]} : vector<1x8x48xf32> to vector<1x8x16xf32>
    %8 = vector.extract_strided_slice %4 {offsets = [0, 7, 16], sizes = [1, 1, 16], strides = [1, 1, 1]} : vector<1x8x48xf32> to vector<1x1x16xf32>
    %9 = vector.shape_cast %8 : vector<1x1x16xf32> to vector<1x16xf32>
    %10 = vector.extract_strided_slice %4 {offsets = [0, 7, 32], sizes = [1, 1, 16], strides = [1, 1, 1]} : vector<1x8x48xf32> to vector<1x1x16xf32>
    %11 = vector.shape_cast %10 : vector<1x1x16xf32> to vector<1x16xf32>
    %c0_6 = arith.constant 0 : index
    %c0_7 = arith.constant 0 : index
    %c0_8 = arith.constant 0 : index
    %12 = vector.load %arg9[%c0_6, %c0_7, %c0_8] : memref<1x16x16xf32, #tpu.memory_space<vmem>>, vector<1x16x16xf32>
    %c0_9 = arith.constant 0 : index
    %c0_10 = arith.constant 0 : index
    %13 = vector.load %arg10[%c0_9, %c0_10] : memref<1x16xf32, #tpu.memory_space<vmem>>, vector<1x16xf32>
    %c0_11 = arith.constant 0 : index
    %c0_12 = arith.constant 0 : index
    %c0_13 = arith.constant 0 : index
    %14 = vector.load %arg11[%c0_11, %c0_12, %c0_13] : memref<1x16x16xf32, #tpu.memory_space<vmem>>, vector<1x16x16xf32>
    %c0_14 = arith.constant 0 : index
    %c0_15 = arith.constant 0 : index
    %15 = vector.load %arg12[%c0_14, %c0_15] : memref<1x16xf32, #tpu.memory_space<vmem>>, vector<1x16xf32>
    "tpu.trace_start"() <{level = 10 : i32, message = "bch,bmh->bcm"}> : () -> ()
    %cst = arith.constant dense<0.000000e+00> : vector<1x8x16xf32>
    %16 = tpu.matmul %5, %12, %cst {dimension_numbers = #tpu.dot_dimension_numbers<[2], [2], [1], [1], [0, 0, 0, 1, 1, 1], [0], [0]>} : vector<1x8x16xf32>, vector<1x16x16xf32>, vector<1x8x16xf32> -> vector<1x8x16xf32>
    "tpu.trace_stop"() : () -> ()
    %17 = vector.shape_cast %13 : vector<1x16xf32> to vector<1x1x16xf32>
    %18 = vector.broadcast %17 : vector<1x1x16xf32> to vector<1x8x16xf32>
    %19 = arith.addf %16, %18 : vector<1x8x16xf32>
    %cst_16 = arith.constant 5.000000e-01 : f32
    %20 = vector.broadcast %cst_16 : f32 to vector<1x8x16xf32>
    %21 = arith.mulf %20, %19 : vector<1x8x16xf32>
    %cst_17 = arith.constant 0.707106769 : f32
    %22 = vector.broadcast %cst_17 : f32 to vector<1x8x16xf32>
    %23 = arith.mulf %19, %22 : vector<1x8x16xf32>
    %24 = math.erf %23 : vector<1x8x16xf32>
    %cst_18 = arith.constant 1.000000e+00 : f32
    %25 = vector.broadcast %cst_18 : f32 to vector<1x8x16xf32>
    %26 = arith.addf %25, %24 : vector<1x8x16xf32>
    %27 = arith.mulf %21, %26 : vector<1x8x16xf32>
    "tpu.trace_start"() <{level = 10 : i32, message = "bcm,bhm->bch"}> : () -> ()
    %cst_19 = arith.constant dense<0.000000e+00> : vector<1x8x16xf32>
    %28 = tpu.matmul %27, %14, %cst_19 {dimension_numbers = #tpu.dot_dimension_numbers<[2], [2], [1], [1], [0, 0, 0, 1, 1, 1], [0], [0]>} : vector<1x8x16xf32>, vector<1x16x16xf32>, vector<1x8x16xf32> -> vector<1x8x16xf32>
    "tpu.trace_stop"() : () -> ()
    %29 = vector.shape_cast %15 : vector<1x16xf32> to vector<1x1x16xf32>
    %30 = vector.broadcast %29 : vector<1x1x16xf32> to vector<1x8x16xf32>
    %31 = arith.addf %28, %30 : vector<1x8x16xf32>
    %c0_20 = arith.constant 0 : index
    %c0_21 = arith.constant 0 : index
    %c0_22 = arith.constant 0 : index
    %32 = vector.load %arg8[%c0_20, %c0_21, %c0_22] : memref<1x16x16xf32, #tpu.memory_space<vmem>>, vector<1x8x16xf32>
    tpu.vector_store %arg8[%c0_20, %c0_21, %c0_22], %31 {strides = array<i32>} : memref<1x16x16xf32, #tpu.memory_space<vmem>>, vector<1x8x16xf32>,
    %33 = arith.subf %31, %6 : vector<1x8x16xf32>
    %34 = arith.mulf %33, %33 : vector<1x8x16xf32>
    %cst_23 = arith.constant dense<0.000000e+00> : vector<1x8xf32>
    %35 = vector.multi_reduction <add>, %34, %cst_23 [2] : vector<1x8x16xf32> to vector<1x8xf32>
    %36 = vector.shape_cast %35 : vector<1x8xf32> to vector<1x8x1xf32>
    %37 = math.sqrt %36 : vector<1x8x1xf32>
    %cst_24 = arith.constant 9.99999971E-10 : f32
    %38 = vector.broadcast %cst_24 : f32 to vector<1x8x1xf32>
    %39 = arith.addf %37, %38 : vector<1x8x1xf32>
    %40 = vector.broadcast %39 : vector<1x8x1xf32> to vector<1x8x16xf32>
    %41 = arith.divf %33, %40 : vector<1x8x16xf32>
    %42 = arith.mulf %7, %41 : vector<1x8x16xf32>
    %43 = vector.broadcast %37 : vector<1x8x1xf32> to vector<1x8x16xf32>
    %44 = arith.cmpf ogt, %43, %7 : vector<1x8x16xf32>
    %45 = arith.select %44, %42, %33 : vector<1x8x16xi1>, vector<1x8x16xf32>
    %cst_25 = arith.constant dense<0.000000e+00> : vector<1xf32>
    %46 = vector.multi_reduction <add>, %11, %cst_25 [1] : vector<1x16xf32> to vector<1xf32>
    %47 = vector.shape_cast %46 : vector<1xf32> to vector<1x1xf32>
    %cst_26 = arith.constant 1.600000e+01 : f32
    %48 = vector.broadcast %cst_26 : f32 to vector<1x1xf32>
    %49 = arith.divf %47, %48 : vector<1x1xf32>
    %50 = vector.shape_cast %49 : vector<1x1xf32> to vector<1x1x1xf32>
    %cst_27 = arith.constant dense<0.000000e+00> : vector<1xf32>
    %51 = vector.multi_reduction <add>, %9, %cst_27 [1] : vector<1x16xf32> to vector<1xf32>
    %52 = vector.shape_cast %51 : vector<1xf32> to vector<1x1xf32>
    %cst_28 = arith.constant 1.600000e+01 : f32
    %53 = vector.broadcast %cst_28 : f32 to vector<1x1xf32>
    %54 = arith.divf %52, %53 : vector<1x1xf32>
    %55 = vector.shape_cast %54 : vector<1x1xf32> to vector<1x1x1xf32>
    %cst_29 = arith.constant dense<0.000000e+00> : vector<1x16xf32>
    %56 = vector.multi_reduction <add>, %45, %cst_29 [1] : vector<1x8x16xf32> to vector<1x16xf32>
    %cst_30 = arith.constant 8.000000e+00 : f32
    %57 = vector.broadcast %cst_30 : f32 to vector<1x16xf32>
    %58 = arith.divf %56, %57 : vector<1x16xf32>
    %cst_31 = arith.constant dense<0.000000e+00> : vector<1x16xf32>
    %59 = vector.multi_reduction <add>, %27, %cst_31 [1] : vector<1x8x16xf32> to vector<1x16xf32>
    %cst_32 = arith.constant 8.000000e+00 : f32
    %60 = vector.broadcast %cst_32 : f32 to vector<1x16xf32>
    %61 = arith.divf %59, %60 : vector<1x16xf32>
    %62 = vector.shape_cast %61 : vector<1x16xf32> to vector<1x16x1xf32>
    %63 = vector.shape_cast %58 : vector<1x16xf32> to vector<1x1x16xf32>
    %64 = vector.broadcast %62 : vector<1x16x1xf32> to vector<1x16x16xf32>
    %65 = vector.broadcast %63 : vector<1x1x16xf32> to vector<1x16x16xf32>
    %66 = arith.mulf %64, %65 : vector<1x16x16xf32>
    %67 = vector.shape_cast %58 : vector<1x16xf32> to vector<1x16x1xf32>
    %68 = vector.shape_cast %61 : vector<1x16xf32> to vector<1x1x16xf32>
    %69 = vector.broadcast %67 : vector<1x16x1xf32> to vector<1x16x16xf32>
    %70 = vector.broadcast %68 : vector<1x1x16xf32> to vector<1x16x16xf32>
    %71 = arith.mulf %69, %70 : vector<1x16x16xf32>
    %72 = vector.broadcast %50 : vector<1x1x1xf32> to vector<1x16x16xf32>
    %73 = arith.mulf %72, %12 : vector<1x16x16xf32>
    %74 = vector.broadcast %55 : vector<1x1x1xf32> to vector<1x16x16xf32>
    %75 = arith.mulf %74, %66 : vector<1x16x16xf32>
    %76 = arith.subf %73, %75 : vector<1x16x16xf32>
    %77 = vector.broadcast %50 : vector<1x1x1xf32> to vector<1x16x16xf32>
    %78 = arith.mulf %77, %14 : vector<1x16x16xf32>
    %79 = vector.broadcast %55 : vector<1x1x1xf32> to vector<1x16x16xf32>
    %80 = arith.mulf %79, %71 : vector<1x16x16xf32>
    %81 = arith.subf %78, %80 : vector<1x16x16xf32>
    "tpu.trace_start"() <{level = 10 : i32, message = "bch,bhm->bcm"}> : () -> ()
    %cst_33 = arith.constant dense<0.000000e+00> : vector<1x8x16xf32>
    %82 = tpu.matmul %45, %81, %cst_33 {dimension_numbers = #tpu.dot_dimension_numbers<[2], [1], [1], [2], [0, 0, 0, 1, 1, 2], [0], [0]>} : vector<1x8x16xf32>, vector<1x16x16xf32>, vector<1x8x16xf32> -> vector<1x8x16xf32>
    "tpu.trace_stop"() : () -> ()
    %cst_34 = arith.constant dense<0.000000e+00> : vector<1x16xf32>
    %83 = vector.multi_reduction <add>, %82, %cst_34 [1] : vector<1x8x16xf32> to vector<1x16xf32>
    %cst_35 = arith.constant 8.000000e+00 : f32
    %84 = vector.broadcast %cst_35 : f32 to vector<1x16xf32>
    %85 = arith.divf %83, %84 : vector<1x16xf32>
    %86 = arith.mulf %11, %15 : vector<1x16xf32>
    %87 = arith.mulf %9, %58 : vector<1x16xf32>
    %88 = arith.subf %86, %87 : vector<1x16xf32>
    %cst_36 = arith.constant dense<0.000000e+00> : vector<1xf32>
    %89 = vector.multi_reduction <add>, %11, %cst_36 [1] : vector<1x16xf32> to vector<1xf32>
    %90 = vector.shape_cast %89 : vector<1xf32> to vector<1x1xf32>
    %cst_37 = arith.constant 1.600000e+01 : f32
    %91 = vector.broadcast %cst_37 : f32 to vector<1x1xf32>
    %92 = arith.divf %90, %91 : vector<1x1xf32>
    %93 = vector.broadcast %92 : vector<1x1xf32> to vector<1x16xf32>
    %94 = arith.mulf %93, %13 : vector<1x16xf32>
    %cst_38 = arith.constant dense<0.000000e+00> : vector<1xf32>
    %95 = vector.multi_reduction <add>, %9, %cst_38 [1] : vector<1x16xf32> to vector<1xf32>
    %96 = vector.shape_cast %95 : vector<1xf32> to vector<1x1xf32>
    %cst_39 = arith.constant 1.600000e+01 : f32
    %97 = vector.broadcast %cst_39 : f32 to vector<1x1xf32>
    %98 = arith.divf %96, %97 : vector<1x1xf32>
    %99 = vector.broadcast %98 : vector<1x1xf32> to vector<1x16xf32>
    %100 = arith.mulf %99, %85 : vector<1x16xf32>
    %101 = arith.subf %94, %100 : vector<1x16xf32>
    %c0_40 = arith.constant 0 : index
    %c0_41 = arith.constant 0 : index
    %c0_42 = arith.constant 0 : index
    %102 = vector.load %arg9[%c0_40, %c0_41, %c0_42] : memref<1x16x16xf32, #tpu.memory_space<vmem>>, vector<1x16x16xf32>
    tpu.vector_store %arg9[%c0_40, %c0_41, %c0_42], %76 {strides = array<i32>} : memref<1x16x16xf32, #tpu.memory_space<vmem>>, vector<1x16x16xf32>,
    %c0_43 = arith.constant 0 : index
    %c0_44 = arith.constant 0 : index
    %c0_45 = arith.constant 0 : index
    %103 = vector.load %arg11[%c0_43, %c0_44, %c0_45] : memref<1x16x16xf32, #tpu.memory_space<vmem>>, vector<1x16x16xf32>
    tpu.vector_store %arg11[%c0_43, %c0_44, %c0_45], %81 {strides = array<i32>} : memref<1x16x16xf32, #tpu.memory_space<vmem>>, vector<1x16x16xf32>,
    %c0_46 = arith.constant 0 : index
    %c0_47 = arith.constant 0 : index
    %104 = vector.load %arg10[%c0_46, %c0_47] : memref<1x16xf32, #tpu.memory_space<vmem>>, vector<1x16xf32>
    tpu.vector_store %arg10[%c0_46, %c0_47], %101 {strides = array<i32>} : memref<1x16xf32, #tpu.memory_space<vmem>>, vector<1x16xf32>,
    %c0_48 = arith.constant 0 : index
    %c0_49 = arith.constant 0 : index
    %105 = vector.load %arg12[%c0_48, %c0_49] : memref<1x16xf32, #tpu.memory_space<vmem>>, vector<1x16xf32>
    tpu.vector_store %arg12[%c0_48, %c0_49], %88 {strides = array<i32>} : memref<1x16xf32, #tpu.memory_space<vmem>>, vector<1x16xf32>,
    %c0_50 = arith.constant 0 : index
    %c8 = arith.constant 8 : index
    %c0_51 = arith.constant 0 : index
    %106 = vector.load %arg2[%c0_50, %c8, %c0_51] : memref<1x16x32xf32, #tpu.memory_space<vmem>>, vector<1x8x32xf32>
    %c0_52 = arith.constant 0 : index
    %c8_53 = arith.constant 8 : index
    %c0_54 = arith.constant 0 : index
    %107 = vector.load %arg3[%c0_52, %c8_53, %c0_54] : memref<1x16x48xf32, #tpu.memory_space<vmem>>, vector<1x8x48xf32>
    %108 = vector.extract_strided_slice %106 {offsets = [0, 0, 0], sizes = [1, 8, 16], strides = [1, 1, 1]} : vector<1x8x32xf32> to vector<1x8x16xf32>
    %109 = vector.extract_strided_slice %106 {offsets = [0, 0, 16], sizes = [1, 8, 16], strides = [1, 1, 1]} : vector<1x8x32xf32> to vector<1x8x16xf32>
    %110 = vector.extract_strided_slice %107 {offsets = [0, 0, 0], sizes = [1, 8, 16], strides = [1, 1, 1]} : vector<1x8x48xf32> to vector<1x8x16xf32>
    %111 = vector.extract_strided_slice %107 {offsets = [0, 7, 16], sizes = [1, 1, 16], strides = [1, 1, 1]} : vector<1x8x48xf32> to vector<1x1x16xf32>
    %112 = vector.shape_cast %111 : vector<1x1x16xf32> to vector<1x16xf32>
    %113 = vector.extract_strided_slice %107 {offsets = [0, 7, 32], sizes = [1, 1, 16], strides = [1, 1, 1]} : vector<1x8x48xf32> to vector<1x1x16xf32>
    %114 = vector.shape_cast %113 : vector<1x1x16xf32> to vector<1x16xf32>
    %c0_55 = arith.constant 0 : index
    %c0_56 = arith.constant 0 : index
    %c0_57 = arith.constant 0 : index
    %115 = vector.load %arg9[%c0_55, %c0_56, %c0_57] : memref<1x16x16xf32, #tpu.memory_space<vmem>>, vector<1x16x16xf32>
    %c0_58 = arith.constant 0 : index
    %c0_59 = arith.constant 0 : index
    %116 = vector.load %arg10[%c0_58, %c0_59] : memref<1x16xf32, #tpu.memory_space<vmem>>, vector<1x16xf32>
    %c0_60 = arith.constant 0 : index
    %c0_61 = arith.constant 0 : index
    %c0_62 = arith.constant 0 : index
    %117 = vector.load %arg11[%c0_60, %c0_61, %c0_62] : memref<1x16x16xf32, #tpu.memory_space<vmem>>, vector<1x16x16xf32>
    %c0_63 = arith.constant 0 : index
    %c0_64 = arith.constant 0 : index
    %118 = vector.load %arg12[%c0_63, %c0_64] : memref<1x16xf32, #tpu.memory_space<vmem>>, vector<1x16xf32>
    "tpu.trace_start"() <{level = 10 : i32, message = "bch,bmh->bcm"}> : () -> ()
    %cst_65 = arith.constant dense<0.000000e+00> : vector<1x8x16xf32>
    %119 = tpu.matmul %108, %115, %cst_65 {dimension_numbers = #tpu.dot_dimension_numbers<[2], [2], [1], [1], [0, 0, 0, 1, 1, 1], [0], [0]>} : vector<1x8x16xf32>, vector<1x16x16xf32>, vector<1x8x16xf32> -> vector<1x8x16xf32>
    "tpu.trace_stop"() : () -> ()
    %120 = vector.shape_cast %116 : vector<1x16xf32> to vector<1x1x16xf32>
    %121 = vector.broadcast %120 : vector<1x1x16xf32> to vector<1x8x16xf32>
    %122 = arith.addf %119, %121 : vector<1x8x16xf32>
    %cst_66 = arith.constant 5.000000e-01 : f32
    %123 = vector.broadcast %cst_66 : f32 to vector<1x8x16xf32>
    %124 = arith.mulf %123, %122 : vector<1x8x16xf32>
    %cst_67 = arith.constant 0.707106769 : f32
    %125 = vector.broadcast %cst_67 : f32 to vector<1x8x16xf32>
    %126 = arith.mulf %122, %125 : vector<1x8x16xf32>
    %127 = math.erf %126 : vector<1x8x16xf32>
    %cst_68 = arith.constant 1.000000e+00 : f32
    %128 = vector.broadcast %cst_68 : f32 to vector<1x8x16xf32>
    %129 = arith.addf %128, %127 : vector<1x8x16xf32>
    %130 = arith.mulf %124, %129 : vector<1x8x16xf32>
    "tpu.trace_start"() <{level = 10 : i32, message = "bcm,bhm->bch"}> : () -> ()
    %cst_69 = arith.constant dense<0.000000e+00> : vector<1x8x16xf32>
    %131 = tpu.matmul %130, %117, %cst_69 {dimension_numbers = #tpu.dot_dimension_numbers<[2], [2], [1], [1], [0, 0, 0, 1, 1, 1], [0], [0]>} : vector<1x8x16xf32>, vector<1x16x16xf32>, vector<1x8x16xf32> -> vector<1x8x16xf32>
    "tpu.trace_stop"() : () -> ()
    %132 = vector.shape_cast %118 : vector<1x16xf32> to vector<1x1x16xf32>
    %133 = vector.broadcast %132 : vector<1x1x16xf32> to vector<1x8x16xf32>
    %134 = arith.addf %131, %133 : vector<1x8x16xf32>
    %c0_70 = arith.constant 0 : index
    %c8_71 = arith.constant 8 : index
    %c0_72 = arith.constant 0 : index
    %135 = vector.load %arg8[%c0_70, %c8_71, %c0_72] : memref<1x16x16xf32, #tpu.memory_space<vmem>>, vector<1x8x16xf32>
    tpu.vector_store %arg8[%c0_70, %c8_71, %c0_72], %134 {strides = array<i32>} : memref<1x16x16xf32, #tpu.memory_space<vmem>>, vector<1x8x16xf32>,
    %136 = arith.subf %134, %109 : vector<1x8x16xf32>
    %137 = arith.mulf %136, %136 : vector<1x8x16xf32>
    %cst_73 = arith.constant dense<0.000000e+00> : vector<1x8xf32>
    %138 = vector.multi_reduction <add>, %137, %cst_73 [2] : vector<1x8x16xf32> to vector<1x8xf32>
    %139 = vector.shape_cast %138 : vector<1x8xf32> to vector<1x8x1xf32>
    %140 = math.sqrt %139 : vector<1x8x1xf32>
    %cst_74 = arith.constant 9.99999971E-10 : f32
    %141 = vector.broadcast %cst_74 : f32 to vector<1x8x1xf32>
    %142 = arith.addf %140, %141 : vector<1x8x1xf32>
    %143 = vector.broadcast %142 : vector<1x8x1xf32> to vector<1x8x16xf32>
    %144 = arith.divf %136, %143 : vector<1x8x16xf32>
    %145 = arith.mulf %110, %144 : vector<1x8x16xf32>
    %146 = vector.broadcast %140 : vector<1x8x1xf32> to vector<1x8x16xf32>
    %147 = arith.cmpf ogt, %146, %110 : vector<1x8x16xf32>
    %148 = arith.select %147, %145, %136 : vector<1x8x16xi1>, vector<1x8x16xf32>
    %cst_75 = arith.constant dense<0.000000e+00> : vector<1xf32>
    %149 = vector.multi_reduction <add>, %114, %cst_75 [1] : vector<1x16xf32> to vector<1xf32>
    %150 = vector.shape_cast %149 : vector<1xf32> to vector<1x1xf32>
    %cst_76 = arith.constant 1.600000e+01 : f32
    %151 = vector.broadcast %cst_76 : f32 to vector<1x1xf32>
    %152 = arith.divf %150, %151 : vector<1x1xf32>
    %153 = vector.shape_cast %152 : vector<1x1xf32> to vector<1x1x1xf32>
    %cst_77 = arith.constant dense<0.000000e+00> : vector<1xf32>
    %154 = vector.multi_reduction <add>, %112, %cst_77 [1] : vector<1x16xf32> to vector<1xf32>
    %155 = vector.shape_cast %154 : vector<1xf32> to vector<1x1xf32>
    %cst_78 = arith.constant 1.600000e+01 : f32
    %156 = vector.broadcast %cst_78 : f32 to vector<1x1xf32>
    %157 = arith.divf %155, %156 : vector<1x1xf32>
    %158 = vector.shape_cast %157 : vector<1x1xf32> to vector<1x1x1xf32>
    %cst_79 = arith.constant dense<0.000000e+00> : vector<1x16xf32>
    %159 = vector.multi_reduction <add>, %148, %cst_79 [1] : vector<1x8x16xf32> to vector<1x16xf32>
    %cst_80 = arith.constant 8.000000e+00 : f32
    %160 = vector.broadcast %cst_80 : f32 to vector<1x16xf32>
    %161 = arith.divf %159, %160 : vector<1x16xf32>
    %cst_81 = arith.constant dense<0.000000e+00> : vector<1x16xf32>
    %162 = vector.multi_reduction <add>, %130, %cst_81 [1] : vector<1x8x16xf32> to vector<1x16xf32>
    %cst_82 = arith.constant 8.000000e+00 : f32
    %163 = vector.broadcast %cst_82 : f32 to vector<1x16xf32>
    %164 = arith.divf %162, %163 : vector<1x16xf32>
    %165 = vector.shape_cast %164 : vector<1x16xf32> to vector<1x16x1xf32>
    %166 = vector.shape_cast %161 : vector<1x16xf32> to vector<1x1x16xf32>
    %167 = vector.broadcast %165 : vector<1x16x1xf32> to vector<1x16x16xf32>
    %168 = vector.broadcast %166 : vector<1x1x16xf32> to vector<1x16x16xf32>
    %169 = arith.mulf %167, %168 : vector<1x16x16xf32>
    %170 = vector.shape_cast %161 : vector<1x16xf32> to vector<1x16x1xf32>
    %171 = vector.shape_cast %164 : vector<1x16xf32> to vector<1x1x16xf32>
    %172 = vector.broadcast %170 : vector<1x16x1xf32> to vector<1x16x16xf32>
    %173 = vector.broadcast %171 : vector<1x1x16xf32> to vector<1x16x16xf32>
    %174 = arith.mulf %172, %173 : vector<1x16x16xf32>
    %175 = vector.broadcast %153 : vector<1x1x1xf32> to vector<1x16x16xf32>
    %176 = arith.mulf %175, %115 : vector<1x16x16xf32>
    %177 = vector.broadcast %158 : vector<1x1x1xf32> to vector<1x16x16xf32>
    %178 = arith.mulf %177, %169 : vector<1x16x16xf32>
    %179 = arith.subf %176, %178 : vector<1x16x16xf32>
    %180 = vector.broadcast %153 : vector<1x1x1xf32> to vector<1x16x16xf32>
    %181 = arith.mulf %180, %117 : vector<1x16x16xf32>
    %182 = vector.broadcast %158 : vector<1x1x1xf32> to vector<1x16x16xf32>
    %183 = arith.mulf %182, %174 : vector<1x16x16xf32>
    %184 = arith.subf %181, %183 : vector<1x16x16xf32>
    "tpu.trace_start"() <{level = 10 : i32, message = "bch,bhm->bcm"}> : () -> ()
    %cst_83 = arith.constant dense<0.000000e+00> : vector<1x8x16xf32>
    %185 = tpu.matmul %148, %184, %cst_83 {dimension_numbers = #tpu.dot_dimension_numbers<[2], [1], [1], [2], [0, 0, 0, 1, 1, 2], [0], [0]>} : vector<1x8x16xf32>, vector<1x16x16xf32>, vector<1x8x16xf32> -> vector<1x8x16xf32>
    "tpu.trace_stop"() : () -> ()
    %cst_84 = arith.constant dense<0.000000e+00> : vector<1x16xf32>
    %186 = vector.multi_reduction <add>, %185, %cst_84 [1] : vector<1x8x16xf32> to vector<1x16xf32>
    %cst_85 = arith.constant 8.000000e+00 : f32
    %187 = vector.broadcast %cst_85 : f32 to vector<1x16xf32>
    %188 = arith.divf %186, %187 : vector<1x16xf32>
    %189 = arith.mulf %114, %118 : vector<1x16xf32>
    %190 = arith.mulf %112, %161 : vector<1x16xf32>
    %191 = arith.subf %189, %190 : vector<1x16xf32>
    %cst_86 = arith.constant dense<0.000000e+00> : vector<1xf32>
    %192 = vector.multi_reduction <add>, %114, %cst_86 [1] : vector<1x16xf32> to vector<1xf32>
    %193 = vector.shape_cast %192 : vector<1xf32> to vector<1x1xf32>
    %cst_87 = arith.constant 1.600000e+01 : f32
    %194 = vector.broadcast %cst_87 : f32 to vector<1x1xf32>
    %195 = arith.divf %193, %194 : vector<1x1xf32>
    %196 = vector.broadcast %195 : vector<1x1xf32> to vector<1x16xf32>
    %197 = arith.mulf %196, %116 : vector<1x16xf32>
    %cst_88 = arith.constant dense<0.000000e+00> : vector<1xf32>
    %198 = vector.multi_reduction <add>, %112, %cst_88 [1] : vector<1x16xf32> to vector<1xf32>
    %199 = vector.shape_cast %198 : vector<1xf32> to vector<1x1xf32>
    %cst_89 = arith.constant 1.600000e+01 : f32
    %200 = vector.broadcast %cst_89 : f32 to vector<1x1xf32>
    %201 = arith.divf %199, %200 : vector<1x1xf32>
    %202 = vector.broadcast %201 : vector<1x1xf32> to vector<1x16xf32>
    %203 = arith.mulf %202, %188 : vector<1x16xf32>
    %204 = arith.subf %197, %203 : vector<1x16xf32>
    %c0_90 = arith.constant 0 : index
    %c0_91 = arith.constant 0 : index
    %c0_92 = arith.constant 0 : index
    %205 = vector.load %arg9[%c0_90, %c0_91, %c0_92] : memref<1x16x16xf32, #tpu.memory_space<vmem>>, vector<1x16x16xf32>
    tpu.vector_store %arg9[%c0_90, %c0_91, %c0_92], %179 {strides = array<i32>} : memref<1x16x16xf32, #tpu.memory_space<vmem>>, vector<1x16x16xf32>,
    %c0_93 = arith.constant 0 : index
    %c0_94 = arith.constant 0 : index
    %c0_95 = arith.constant 0 : index
    %206 = vector.load %arg11[%c0_93, %c0_94, %c0_95] : memref<1x16x16xf32, #tpu.memory_space<vmem>>, vector<1x16x16xf32>
    tpu.vector_store %arg11[%c0_93, %c0_94, %c0_95], %184 {strides = array<i32>} : memref<1x16x16xf32, #tpu.memory_space<vmem>>, vector<1x16x16xf32>,
    %c0_96 = arith.constant 0 : index
    %c0_97 = arith.constant 0 : index
    %207 = vector.load %arg10[%c0_96, %c0_97] : memref<1x16xf32, #tpu.memory_space<vmem>>, vector<1x16xf32>
    tpu.vector_store %arg10[%c0_96, %c0_97], %204 {strides = array<i32>} : memref<1x16xf32, #tpu.memory_space<vmem>>, vector<1x16xf32>,
    %c0_98 = arith.constant 0 : index
    %c0_99 = arith.constant 0 : index
    %208 = vector.load %arg12[%c0_98, %c0_99] : memref<1x16xf32, #tpu.memory_space<vmem>>, vector<1x16xf32>
    tpu.vector_store %arg12[%c0_98, %c0_99], %191 {strides = array<i32>} : memref<1x16xf32, #tpu.memory_space<vmem>>, vector<1x16xf32>,
    return
  }
  func.func @transform_0(%arg0: i32, %arg1: i32) -> (i32, i32, i32) {
    %c0_i32 = arith.constant 0 : i32
    %c0_i32_0 = arith.constant 0 : i32
    return %arg0, %arg1, %c0_i32 : i32, i32, i32
  }
  func.func @transform_1(%arg0: i32, %arg1: i32) -> (i32, i32, i32) {
    %c0_i32 = arith.constant 0 : i32
    %c0_i32_0 = arith.constant 0 : i32
    return %arg0, %arg1, %c0_i32 : i32, i32, i32
  }
  func.func @transform_2(%arg0: i32, %arg1: i32) -> (i32, i32) {
    %c0_i32 = arith.constant 0 : i32
    %c0_i32_0 = arith.constant 0 : i32
    %c0_i32_1 = arith.constant 0 : i32
    return %c0_i32, %c0_i32_0 : i32, i32
  }
  func.func @transform_3(%arg0: i32, %arg1: i32) -> (i32, i32) {
    %c0_i32 = arith.constant 0 : i32
    %c0_i32_0 = arith.constant 0 : i32
    %c0_i32_1 = arith.constant 0 : i32
    return %c0_i32, %c0_i32_0 : i32, i32
  }
  func.func @transform_4(%arg0: i32, %arg1: i32) -> (i32, i32) {
    %c0_i32 = arith.constant 0 : i32
    %c0_i32_0 = arith.constant 0 : i32
    %c0_i32_1 = arith.constant 0 : i32
    return %c0_i32, %c0_i32_0 : i32, i32
  }
  func.func @transform_5(%arg0: i32, %arg1: i32) -> (i32, i32) {
    %c0_i32 = arith.constant 0 : i32
    %c0_i32_0 = arith.constant 0 : i32
    %c0_i32_1 = arith.constant 0 : i32
    return %c0_i32, %c0_i32_0 : i32, i32
  }
  func.func @transform_6(%arg0: i32, %arg1: i32) -> (i32, i32, i32) {
    %c0_i32 = arith.constant 0 : i32
    %c0_i32_0 = arith.constant 0 : i32
    return %arg0, %arg1, %c0_i32 : i32, i32, i32
  }
}

module attributes {stable_mosaic.version = 11 : i64} {
  func.func @kernel(%arg0: i32, %arg1: memref<16x32xf32, #tpu.memory_space<vmem>>, %arg2: memref<1x32xf32, #tpu.memory_space<vmem>>, %arg3: memref<32x32xbf16, #tpu.memory_space<vmem>>, %arg4: memref<32x24xbf16, #tpu.memory_space<vmem>>, %arg5: memref<24x48xbf16, #tpu.memory_space<vmem>>, %arg6: memref<16x32xf32, #tpu.memory_space<vmem>>, %arg7: memref<16x48xf32, #tpu.memory_space<vmem>>) attributes {dimension_semantics = [#tpu.dimension_semantics<parallel>], iteration_bounds = array<i64: 2>, scalar_prefetch = 0 : i64, scratch_operands = 0 : i64, tpu.core_type = #tpu.core_type<tc>, window_params = [{transform_indices = @transform_0, window_bounds = array<i64: 16, 32>}, {pipeline_mode = #tpu.pipeline_mode<synchronous>, transform_indices = @transform_1, window_bounds = array<i64: 1, 32>}, {pipeline_mode = #tpu.pipeline_mode<synchronous>, transform_indices = @transform_2, window_bounds = array<i64: 32, 32>}, {pipeline_mode = #tpu.pipeline_mode<synchronous>, transform_indices = @transform_3, window_bounds = array<i64: 32, 24>}, {pipeline_mode = #tpu.pipeline_mode<synchronous>, transform_indices = @transform_4, window_bounds = array<i64: 24, 48>}, {transform_indices = @transform_5, window_bounds = array<i64: 16, 32>}, {transform_indices = @transform_6, window_bounds = array<i64: 16, 48>}]} {
    %c0 = arith.constant 0 : index
    %c0_0 = arith.constant 0 : index
    %0 = vector.load %arg1[%c0, %c0_0] : memref<16x32xf32, #tpu.memory_space<vmem>>, vector<16x32xf32>
    %1 = arith.mulf %0, %0 : vector<16x32xf32>
    %cst = arith.constant dense<0.000000e+00> : vector<16xf32>
    %2 = vector.multi_reduction <add>, %1, %cst [1] : vector<16x32xf32> to vector<16xf32>
    %3 = vector.shape_cast %2 : vector<16xf32> to vector<16x1xf32>
    %cst_1 = arith.constant 3.200000e+01 : f32
    %4 = vector.broadcast %cst_1 : f32 to vector<16x1xf32>
    %5 = arith.divf %3, %4 : vector<16x1xf32>
    %cst_2 = arith.constant 1.1920929E-7 : f32
    %6 = vector.broadcast %cst_2 : f32 to vector<16x1xf32>
    %7 = arith.addf %5, %6 : vector<16x1xf32>
    %8 = math.rsqrt %7 : vector<16x1xf32>
    %9 = vector.broadcast %8 : vector<16x1xf32> to vector<16x32xf32>
    %10 = arith.mulf %0, %9 : vector<16x32xf32>
    %c0_3 = arith.constant 0 : index
    %c0_4 = arith.constant 0 : index
    %11 = vector.load %arg2[%c0_3, %c0_4] : memref<1x32xf32, #tpu.memory_space<vmem>>, vector<1x32xf32>
    %12 = vector.broadcast %11 : vector<1x32xf32> to vector<16x32xf32>
    %13 = arith.mulf %10, %12 : vector<16x32xf32>
    %14 = arith.truncf %13 : vector<16x32xf32> to vector<16x32xbf16>
    %c0_5 = arith.constant 0 : index
    %c0_6 = arith.constant 0 : index
    %15 = vector.load %arg3[%c0_5, %c0_6] : memref<32x32xbf16, #tpu.memory_space<vmem>>, vector<32x32xbf16>
    %cst_7 = arith.constant dense<0.000000e+00> : vector<16x32xf32>
    %16 = tpu.matmul %14, %15, %cst_7 {dimension_numbers = #tpu.dot_dimension_numbers<[1], [0], [0], [1], [0, 0, 1, 1], [], []>} : vector<16x32xbf16>, vector<32x32xbf16>, vector<16x32xf32> -> vector<16x32xf32>
    %c0_8 = arith.constant 0 : index
    %c0_9 = arith.constant 0 : index
    %17 = vector.load %arg6[%c0_8, %c0_9] : memref<16x32xf32, #tpu.memory_space<vmem>>, vector<16x32xf32>
    tpu.vector_store %arg6[%c0_8, %c0_9], %16 {strides = array<i32>} : memref<16x32xf32, #tpu.memory_space<vmem>>, vector<16x32xf32>,
    %c0_10 = arith.constant 0 : index
    %c0_11 = arith.constant 0 : index
    %18 = vector.load %arg4[%c0_10, %c0_11] : memref<32x24xbf16, #tpu.memory_space<vmem>>, vector<32x24xbf16>
    %cst_12 = arith.constant dense<0.000000e+00> : vector<16x24xf32>
    %19 = tpu.matmul %14, %18, %cst_12 {dimension_numbers = #tpu.dot_dimension_numbers<[1], [0], [0], [1], [0, 0, 1, 1], [], []>} : vector<16x32xbf16>, vector<32x24xbf16>, vector<16x24xf32> -> vector<16x24xf32>
    %20 = arith.truncf %19 : vector<16x24xf32> to vector<16x24xbf16>
    %c0_13 = arith.constant 0 : index
    %c0_14 = arith.constant 0 : index
    %21 = vector.load %arg5[%c0_13, %c0_14] : memref<24x48xbf16, #tpu.memory_space<vmem>>, vector<24x48xbf16>
    %cst_15 = arith.constant dense<0.000000e+00> : vector<16x48xf32>
    %22 = tpu.matmul %20, %21, %cst_15 {dimension_numbers = #tpu.dot_dimension_numbers<[1], [0], [0], [1], [0, 0, 1, 1], [], []>} : vector<16x24xbf16>, vector<24x48xbf16>, vector<16x48xf32> -> vector<16x48xf32>
    %23 = vector.extract_strided_slice %22 {offsets = [0, 0], sizes = [16, 16], strides = [1, 1]} : vector<16x48xf32> to vector<16x16xf32>
    %cst_16 = arith.constant 0.000000e+00 : f32
    %24 = vector.broadcast %cst_16 : f32 to vector<16x16xf32>
    %25 = arith.maximumf %23, %24 : vector<16x16xf32>
    %26 = vector.broadcast %cst_16 : f32 to vector<16x16xf32>
    %27 = arith.subf %23, %26 : vector<16x16xf32>
    %28 = arith.cmpf one, %27, %27 : vector<16x16xf32>
    %29 = vector.broadcast %cst_16 : f32 to vector<16x16xf32>
    %30 = arith.addf %23, %29 : vector<16x16xf32>
    %31 = math.absf %27 : vector<16x16xf32>
    %cst_17 = arith.constant 0.000000e+00 : f32
    %32 = vector.broadcast %cst_17 : f32 to vector<16x16xf32>
    %33 = arith.subf %32, %31 : vector<16x16xf32>
    %34 = math.exp %33 : vector<16x16xf32>
    %35 = math.log1p %34 : vector<16x16xf32>
    %36 = arith.addf %25, %35 : vector<16x16xf32>
    %37 = arith.select %28, %30, %36 : vector<16x16xi1>, vector<16x16xf32>
    %38 = vector.extract_strided_slice %22 {offsets = [0, 16], sizes = [16, 16], strides = [1, 1]} : vector<16x48xf32> to vector<16x16xf32>
    %cst_18 = arith.constant 0.000000e+00 : f32
    %39 = vector.broadcast %cst_18 : f32 to vector<16x16xf32>
    %40 = arith.maximumf %38, %39 : vector<16x16xf32>
    %41 = vector.broadcast %cst_18 : f32 to vector<16x16xf32>
    %42 = arith.subf %38, %41 : vector<16x16xf32>
    %43 = arith.cmpf one, %42, %42 : vector<16x16xf32>
    %44 = vector.broadcast %cst_18 : f32 to vector<16x16xf32>
    %45 = arith.addf %38, %44 : vector<16x16xf32>
    %46 = math.absf %42 : vector<16x16xf32>
    %cst_19 = arith.constant 0.000000e+00 : f32
    %47 = vector.broadcast %cst_19 : f32 to vector<16x16xf32>
    %48 = arith.subf %47, %46 : vector<16x16xf32>
    %49 = math.exp %48 : vector<16x16xf32>
    %50 = math.log1p %49 : vector<16x16xf32>
    %51 = arith.addf %40, %50 : vector<16x16xf32>
    %52 = arith.select %43, %45, %51 : vector<16x16xi1>, vector<16x16xf32>
    %53 = vector.extract_strided_slice %22 {offsets = [0, 32], sizes = [16, 16], strides = [1, 1]} : vector<16x48xf32> to vector<16x16xf32>
    %54 = arith.negf %53 : vector<16x16xf32>
    %55 = math.exp %54 : vector<16x16xf32>
    %cst_20 = arith.constant 1.000000e+00 : f32
    %56 = vector.broadcast %cst_20 : f32 to vector<16x16xf32>
    %57 = arith.addf %56, %55 : vector<16x16xf32>
    %58 = arith.divf %56, %57 : vector<16x16xf32>
    %59 = tpu.concatenate %37, %52, %58 in 1 : vector<16x16xf32>, vector<16x16xf32>, vector<16x16xf32> -> vector<16x48xf32>
    %c0_21 = arith.constant 0 : index
    %c0_22 = arith.constant 0 : index
    %60 = vector.load %arg7[%c0_21, %c0_22] : memref<16x48xf32, #tpu.memory_space<vmem>>, vector<16x48xf32>
    tpu.vector_store %arg7[%c0_21, %c0_22], %59 {strides = array<i32>} : memref<16x48xf32, #tpu.memory_space<vmem>>, vector<16x48xf32>,
    return
  }
  func.func @transform_0(%arg0: i32) -> (i32, i32) {
    %c0_i32 = arith.constant 0 : i32
    %c0_i32_0 = arith.constant 0 : i32
    return %arg0, %c0_i32 : i32, i32
  }
  func.func @transform_1(%arg0: i32) -> (i32, i32) {
    %c0_i32 = arith.constant 0 : i32
    %c0_i32_0 = arith.constant 0 : i32
    %c0_i32_1 = arith.constant 0 : i32
    return %c0_i32, %c0_i32_0 : i32, i32
  }
  func.func @transform_2(%arg0: i32) -> (i32, i32) {
    %c0_i32 = arith.constant 0 : i32
    %c0_i32_0 = arith.constant 0 : i32
    %c0_i32_1 = arith.constant 0 : i32
    return %c0_i32, %c0_i32_0 : i32, i32
  }
  func.func @transform_3(%arg0: i32) -> (i32, i32) {
    %c0_i32 = arith.constant 0 : i32
    %c0_i32_0 = arith.constant 0 : i32
    %c0_i32_1 = arith.constant 0 : i32
    return %c0_i32, %c0_i32_0 : i32, i32
  }
  func.func @transform_4(%arg0: i32) -> (i32, i32) {
    %c0_i32 = arith.constant 0 : i32
    %c0_i32_0 = arith.constant 0 : i32
    %c0_i32_1 = arith.constant 0 : i32
    return %c0_i32, %c0_i32_0 : i32, i32
  }
  func.func @transform_5(%arg0: i32) -> (i32, i32) {
    %c0_i32 = arith.constant 0 : i32
    %c0_i32_0 = arith.constant 0 : i32
    return %arg0, %c0_i32 : i32, i32
  }
  func.func @transform_6(%arg0: i32) -> (i32, i32) {
    %c0_i32 = arith.constant 0 : i32
    %c0_i32_0 = arith.constant 0 : i32
    return %arg0, %c0_i32 : i32, i32
  }
}

module attributes {stable_mosaic.version = 11 : i64} {
  func.func @_epilogue_kernel(%arg0: i32, %arg1: i32, %arg2: memref<16x32xf32, #tpu.memory_space<vmem>>, %arg3: memref<16x16xf32, #tpu.memory_space<vmem>>, %arg4: memref<1x32xf32, #tpu.memory_space<vmem>>, %arg5: memref<32x32xbf16, #tpu.memory_space<vmem>>, %arg6: memref<16x32xbf16, #tpu.memory_space<vmem>>, %arg7: memref<1x32xf32, #tpu.memory_space<vmem>>, %arg8: memref<32x64xbf16, #tpu.memory_space<vmem>>, %arg9: memref<32x64xbf16, #tpu.memory_space<vmem>>, %arg10: memref<64x32xbf16, #tpu.memory_space<vmem>>, %arg11: memref<16x32xf32, #tpu.memory_space<vmem>>, %arg12: memref<16x32xf32, #tpu.memory_space<vmem>>, %arg13: memref<16x32xf32, #tpu.memory_space<vmem>>) attributes {dimension_semantics = [#tpu.dimension_semantics<parallel>, #tpu.dimension_semantics<arbitrary>], iteration_bounds = array<i64: 2, 1>, scalar_prefetch = 0 : i64, scratch_operands = 2 : i64, tpu.core_type = #tpu.core_type<tc>, window_params = [{transform_indices = @transform_0, window_bounds = array<i64: 16, 32>}, {transform_indices = @transform_1, window_bounds = array<i64: 16, 16>}, {pipeline_mode = #tpu.pipeline_mode<synchronous>, transform_indices = @transform_2, window_bounds = array<i64: 1, 32>}, {pipeline_mode = #tpu.pipeline_mode<synchronous>, transform_indices = @transform_3, window_bounds = array<i64: 32, 32>}, {pipeline_mode = #tpu.pipeline_mode<synchronous>, transform_indices = @transform_4, window_bounds = array<i64: 16, 32>}, {pipeline_mode = #tpu.pipeline_mode<synchronous>, transform_indices = @transform_5, window_bounds = array<i64: 1, 32>}, {transform_indices = @transform_6, window_bounds = array<i64: 32, 64>}, {transform_indices = @transform_7, window_bounds = array<i64: 32, 64>}, {transform_indices = @transform_8, window_bounds = array<i64: 64, 32>}, {transform_indices = @transform_9, window_bounds = array<i64: 16, 32>}]} {
    %c0_i32 = arith.constant 0 : i32
    %0 = arith.cmpi eq, %arg1, %c0_i32 : i32
    %1 = arith.extui %0 : i1 to i32
    %c0_i32_0 = arith.constant 0 : i32
    %2 = arith.cmpi ne, %1, %c0_i32_0 : i32
    scf.if %2 {
      %c0_22 = arith.constant 0 : index
      %c0_23 = arith.constant 0 : index
      %38 = vector.load %arg2[%c0_22, %c0_23] : memref<16x32xf32, #tpu.memory_space<vmem>>, vector<16x32xf32>
      %39 = arith.mulf %38, %38 : vector<16x32xf32>
      %cst_24 = arith.constant dense<0.000000e+00> : vector<16xf32>
      %40 = vector.multi_reduction <add>, %39, %cst_24 [1] : vector<16x32xf32> to vector<16xf32>
      %41 = vector.shape_cast %40 : vector<16xf32> to vector<16x1xf32>
      %cst_25 = arith.constant 3.200000e+01 : f32
      %42 = vector.broadcast %cst_25 : f32 to vector<16x1xf32>
      %43 = arith.divf %41, %42 : vector<16x1xf32>
      %cst_26 = arith.constant 1.1920929E-7 : f32
      %44 = vector.broadcast %cst_26 : f32 to vector<16x1xf32>
      %45 = arith.addf %43, %44 : vector<16x1xf32>
      %46 = math.rsqrt %45 : vector<16x1xf32>
      %47 = vector.broadcast %46 : vector<16x1xf32> to vector<16x32xf32>
      %48 = arith.mulf %38, %47 : vector<16x32xf32>
      %c0_27 = arith.constant 0 : index
      %c0_28 = arith.constant 0 : index
      %49 = vector.load %arg4[%c0_27, %c0_28] : memref<1x32xf32, #tpu.memory_space<vmem>>, vector<1x32xf32>
      %50 = vector.broadcast %49 : vector<1x32xf32> to vector<16x32xf32>
      %51 = arith.mulf %48, %50 : vector<16x32xf32>
      %52 = arith.truncf %51 : vector<16x32xf32> to vector<16x32xbf16>
      %c0_29 = arith.constant 0 : index
      %c0_30 = arith.constant 0 : index
      %53 = vector.load %arg5[%c0_29, %c0_30] : memref<32x32xbf16, #tpu.memory_space<vmem>>, vector<32x32xbf16>
      %cst_31 = arith.constant dense<0.000000e+00> : vector<16x32xf32>
      %54 = tpu.matmul %52, %53, %cst_31 {dimension_numbers = #tpu.dot_dimension_numbers<[1], [0], [0], [1], [0, 0, 1, 1], [], []>} : vector<16x32xbf16>, vector<32x32xbf16>, vector<16x32xf32> -> vector<16x32xf32>
      %55 = arith.negf %54 : vector<16x32xf32>
      %56 = math.exp %55 : vector<16x32xf32>
      %cst_32 = arith.constant 1.000000e+00 : f32
      %57 = vector.broadcast %cst_32 : f32 to vector<16x32xf32>
      %58 = arith.addf %57, %56 : vector<16x32xf32>
      %59 = arith.divf %57, %58 : vector<16x32xf32>
      %c0_33 = arith.constant 0 : index
      %c0_34 = arith.constant 0 : index
      %60 = vector.load %arg3[%c0_33, %c0_34] : memref<16x16xf32, #tpu.memory_space<vmem>>, vector<16x16xf32>
      %61 = arith.truncf %60 : vector<16x16xf32> to vector<16x16xbf16>
      %c0_35 = arith.constant 0 : index
      %c0_36 = arith.constant 0 : index
      %62 = vector.load %arg6[%c0_35, %c0_36] : memref<16x32xbf16, #tpu.memory_space<vmem>>, vector<16x32xbf16>
      %cst_37 = arith.constant dense<0.000000e+00> : vector<16x32xf32>
      %63 = tpu.matmul %61, %62, %cst_37 {dimension_numbers = #tpu.dot_dimension_numbers<[1], [0], [0], [1], [0, 0, 1, 1], [], []>} : vector<16x16xbf16>, vector<16x32xbf16>, vector<16x32xf32> -> vector<16x32xf32>
      %64 = arith.mulf %63, %59 : vector<16x32xf32>
      %65 = arith.addf %38, %64 : vector<16x32xf32>
      %c0_38 = arith.constant 0 : index
      %c0_39 = arith.constant 0 : index
      %66 = vector.load %arg12[%c0_38, %c0_39] : memref<16x32xf32, #tpu.memory_space<vmem>>, vector<16x32xf32>
      tpu.vector_store %arg12[%c0_38, %c0_39], %65 {strides = array<i32>} : memref<16x32xf32, #tpu.memory_space<vmem>>, vector<16x32xf32>,
      %cst_40 = arith.constant 0.000000e+00 : f32
      %67 = vector.broadcast %cst_40 : f32 to vector<16x32xf32>
      %c0_41 = arith.constant 0 : index
      %c0_42 = arith.constant 0 : index
      %68 = vector.load %arg13[%c0_41, %c0_42] : memref<16x32xf32, #tpu.memory_space<vmem>>, vector<16x32xf32>
      tpu.vector_store %arg13[%c0_41, %c0_42], %67 {strides = array<i32>} : memref<16x32xf32, #tpu.memory_space<vmem>>, vector<16x32xf32>,
    } else {
    }
    %c0 = arith.constant 0 : index
    %c0_1 = arith.constant 0 : index
    %3 = vector.load %arg12[%c0, %c0_1] : memref<16x32xf32, #tpu.memory_space<vmem>>, vector<16x32xf32>
    %4 = arith.mulf %3, %3 : vector<16x32xf32>
    %cst = arith.constant dense<0.000000e+00> : vector<16xf32>
    %5 = vector.multi_reduction <add>, %4, %cst [1] : vector<16x32xf32> to vector<16xf32>
    %6 = vector.shape_cast %5 : vector<16xf32> to vector<16x1xf32>
    %cst_2 = arith.constant 3.200000e+01 : f32
    %7 = vector.broadcast %cst_2 : f32 to vector<16x1xf32>
    %8 = arith.divf %6, %7 : vector<16x1xf32>
    %cst_3 = arith.constant 1.1920929E-7 : f32
    %9 = vector.broadcast %cst_3 : f32 to vector<16x1xf32>
    %10 = arith.addf %8, %9 : vector<16x1xf32>
    %11 = math.rsqrt %10 : vector<16x1xf32>
    %12 = vector.broadcast %11 : vector<16x1xf32> to vector<16x32xf32>
    %13 = arith.mulf %3, %12 : vector<16x32xf32>
    %c0_4 = arith.constant 0 : index
    %c0_5 = arith.constant 0 : index
    %14 = vector.load %arg7[%c0_4, %c0_5] : memref<1x32xf32, #tpu.memory_space<vmem>>, vector<1x32xf32>
    %15 = vector.broadcast %14 : vector<1x32xf32> to vector<16x32xf32>
    %16 = arith.mulf %13, %15 : vector<16x32xf32>
    %17 = arith.truncf %16 : vector<16x32xf32> to vector<16x32xbf16>
    %c0_6 = arith.constant 0 : index
    %c0_7 = arith.constant 0 : index
    %18 = vector.load %arg8[%c0_6, %c0_7] : memref<32x64xbf16, #tpu.memory_space<vmem>>, vector<32x64xbf16>
    %cst_8 = arith.constant dense<0.000000e+00> : vector<16x64xf32>
    %19 = tpu.matmul %17, %18, %cst_8 {dimension_numbers = #tpu.dot_dimension_numbers<[1], [0], [0], [1], [0, 0, 1, 1], [], []>} : vector<16x32xbf16>, vector<32x64xbf16>, vector<16x64xf32> -> vector<16x64xf32>
    %c0_9 = arith.constant 0 : index
    %c0_10 = arith.constant 0 : index
    %20 = vector.load %arg9[%c0_9, %c0_10] : memref<32x64xbf16, #tpu.memory_space<vmem>>, vector<32x64xbf16>
    %cst_11 = arith.constant dense<0.000000e+00> : vector<16x64xf32>
    %21 = tpu.matmul %17, %20, %cst_11 {dimension_numbers = #tpu.dot_dimension_numbers<[1], [0], [0], [1], [0, 0, 1, 1], [], []>} : vector<16x32xbf16>, vector<32x64xbf16>, vector<16x64xf32> -> vector<16x64xf32>
    %22 = arith.negf %19 : vector<16x64xf32>
    %23 = math.exp %22 : vector<16x64xf32>
    %cst_12 = arith.constant 1.000000e+00 : f32
    %24 = vector.broadcast %cst_12 : f32 to vector<16x64xf32>
    %25 = arith.addf %24, %23 : vector<16x64xf32>
    %26 = arith.divf %24, %25 : vector<16x64xf32>
    %27 = arith.mulf %19, %26 : vector<16x64xf32>
    %28 = arith.mulf %27, %21 : vector<16x64xf32>
    %29 = arith.truncf %28 : vector<16x64xf32> to vector<16x64xbf16>
    %c0_13 = arith.constant 0 : index
    %c0_14 = arith.constant 0 : index
    %30 = vector.load %arg13[%c0_13, %c0_14] : memref<16x32xf32, #tpu.memory_space<vmem>>, vector<16x32xf32>
    %c0_15 = arith.constant 0 : index
    %c0_16 = arith.constant 0 : index
    %31 = vector.load %arg10[%c0_15, %c0_16] : memref<64x32xbf16, #tpu.memory_space<vmem>>, vector<64x32xbf16>
    %cst_17 = arith.constant dense<0.000000e+00> : vector<16x32xf32>
    %32 = tpu.matmul %29, %31, %cst_17 {dimension_numbers = #tpu.dot_dimension_numbers<[1], [0], [0], [1], [0, 0, 1, 1], [], []>} : vector<16x64xbf16>, vector<64x32xbf16>, vector<16x32xf32> -> vector<16x32xf32>
    %33 = arith.addf %30, %32 : vector<16x32xf32>
    %c0_18 = arith.constant 0 : index
    %c0_19 = arith.constant 0 : index
    %34 = vector.load %arg13[%c0_18, %c0_19] : memref<16x32xf32, #tpu.memory_space<vmem>>, vector<16x32xf32>
    tpu.vector_store %arg13[%c0_18, %c0_19], %33 {strides = array<i32>} : memref<16x32xf32, #tpu.memory_space<vmem>>, vector<16x32xf32>,
    %c0_i32_20 = arith.constant 0 : i32
    %35 = arith.cmpi eq, %arg1, %c0_i32_20 : i32
    %36 = arith.extui %35 : i1 to i32
    %c0_i32_21 = arith.constant 0 : i32
    %37 = arith.cmpi ne, %36, %c0_i32_21 : i32
    scf.if %37 {
      %c0_22 = arith.constant 0 : index
      %c0_23 = arith.constant 0 : index
      %38 = vector.load %arg12[%c0_22, %c0_23] : memref<16x32xf32, #tpu.memory_space<vmem>>, vector<16x32xf32>
      %c0_24 = arith.constant 0 : index
      %c0_25 = arith.constant 0 : index
      %39 = vector.load %arg13[%c0_24, %c0_25] : memref<16x32xf32, #tpu.memory_space<vmem>>, vector<16x32xf32>
      %40 = arith.addf %38, %39 : vector<16x32xf32>
      %c0_26 = arith.constant 0 : index
      %c0_27 = arith.constant 0 : index
      %41 = vector.load %arg11[%c0_26, %c0_27] : memref<16x32xf32, #tpu.memory_space<vmem>>, vector<16x32xf32>
      tpu.vector_store %arg11[%c0_26, %c0_27], %40 {strides = array<i32>} : memref<16x32xf32, #tpu.memory_space<vmem>>, vector<16x32xf32>,
    } else {
    }
    return
  }
  func.func @transform_0(%arg0: i32, %arg1: i32) -> (i32, i32) {
    %c0_i32 = arith.constant 0 : i32
    %c0_i32_0 = arith.constant 0 : i32
    return %arg0, %c0_i32 : i32, i32
  }
  func.func @transform_1(%arg0: i32, %arg1: i32) -> (i32, i32) {
    %c0_i32 = arith.constant 0 : i32
    %c0_i32_0 = arith.constant 0 : i32
    return %arg0, %c0_i32 : i32, i32
  }
  func.func @transform_2(%arg0: i32, %arg1: i32) -> (i32, i32) {
    %c0_i32 = arith.constant 0 : i32
    %c0_i32_0 = arith.constant 0 : i32
    %c0_i32_1 = arith.constant 0 : i32
    return %c0_i32, %c0_i32_0 : i32, i32
  }
  func.func @transform_3(%arg0: i32, %arg1: i32) -> (i32, i32) {
    %c0_i32 = arith.constant 0 : i32
    %c0_i32_0 = arith.constant 0 : i32
    %c0_i32_1 = arith.constant 0 : i32
    return %c0_i32, %c0_i32_0 : i32, i32
  }
  func.func @transform_4(%arg0: i32, %arg1: i32) -> (i32, i32) {
    %c0_i32 = arith.constant 0 : i32
    %c0_i32_0 = arith.constant 0 : i32
    %c0_i32_1 = arith.constant 0 : i32
    return %c0_i32, %c0_i32_0 : i32, i32
  }
  func.func @transform_5(%arg0: i32, %arg1: i32) -> (i32, i32) {
    %c0_i32 = arith.constant 0 : i32
    %c0_i32_0 = arith.constant 0 : i32
    %c0_i32_1 = arith.constant 0 : i32
    return %c0_i32, %c0_i32_0 : i32, i32
  }
  func.func @transform_6(%arg0: i32, %arg1: i32) -> (i32, i32) {
    %c0_i32 = arith.constant 0 : i32
    %c0_i32_0 = arith.constant 0 : i32
    return %c0_i32, %arg1 : i32, i32
  }
  func.func @transform_7(%arg0: i32, %arg1: i32) -> (i32, i32) {
    %c0_i32 = arith.constant 0 : i32
    %c0_i32_0 = arith.constant 0 : i32
    return %c0_i32, %arg1 : i32, i32
  }
  func.func @transform_8(%arg0: i32, %arg1: i32) -> (i32, i32) {
    %c0_i32 = arith.constant 0 : i32
    %c0_i32_0 = arith.constant 0 : i32
    return %arg1, %c0_i32 : i32, i32
  }
  func.func @transform_9(%arg0: i32, %arg1: i32) -> (i32, i32) {
    %c0_i32 = arith.constant 0 : i32
    %c0_i32_0 = arith.constant 0 : i32
    return %arg0, %c0_i32 : i32, i32
  }
}

</mosaic_0001>

<bundles_post_ra>
// kernel: yaad_block_forward.5
= control target key start
LH: loop header
LB: loop body
LE: loop exit
PB: predicated region body
PF: predicated region fallthrough
CT: control target
= control target key end

     0   :  { %s469_s18 = smov 0   ;;  %s520_s0 = inlined_call_operand.vmem [shape: f32[2,16,32], index: 0, kind: input, shape index: {}]   ;;  %s521_s1 = inlined_call_operand.vmem [shape: f32[4,32], index: 1, kind: input, shape index: {}]   ;;  %s522_s2 = inlined_call_operand.vmem [shape: f32[1,32], index: 2, kind: input, shape index: {}]   ;;  %s523_s3 = inlined_call_operand.vmem [shape: f32[1,16], index: 3, kind: input, shape index: {}]   ;;  %s524_s4 = inlined_call_operand.vmem [shape: f32[1,16], index: 4, kind: input, shape index: {}]   ;;  %s525_s5 = inlined_call_operand.vmem [shape: f32[2,16,32], index: 5, kind: output, shape index: {}]  }
   0x1 LB: > { %s403_s19 = sadd.s32 4294967295, %s437_s18   ;;  %p407_p0 = scmp.ge.s32.totalorder %s437_s18, 1  ;;  %s437_s18 = sphi %s469_s18, %s15_s18  }
   0x2   : > { %p187_p1 = scmp.lt.s32.totalorder %s437_s18, 3 }
   0x4   : > { %p188_p2 = pnand %p407_p0, %p187_p1 }
   0x5   : > { %p215_p3 = scmp.lt.s32.totalorder (!%p188_p2), %s403_s19, 1 }
   0x6   : > { %191 = sbr.rel (%p188_p2) target bundleno = 346 (0x15a), region = 40 }
   0xb   : > { %v228_v0 = vlaneseq  ;;  %s527_s19 = smov (!%p215_p3, %s403_s19), 1  ;;  %v227_v2 = vld [vmem:[%s521_s1] sm:$0xf]  ;;  %vm297_vm6 = vcmask 130048   ;;  %vm345_vm7 = vcmask 261120  }
   0xc   : > { %s417_s22 = sshll.u32 %s527_s19, 4  ;;  %v412_v40 = vld [vmem:[%s522_s2] ss:$0 sm:$0xff] }
   0xd   : > { %v229_v1 = vshrl.u32 %v228_v0, 7  ;;  %s219_s25 = scalar_lea.vmem %s520_s0, %s417_s22  ;;  %v413_v0 = vld [vmem:[%s523_s3] ss:$0 sm:$0xff]  ;;  %s224_s9 = scalar_lea.vmem %s525_s5, %s417_s22 }
   0xe   : > { %v225_v6 = vld [vmem:[%s219_s25] sm:$0xff]  ;;  %v226_v7 = vld [vmem:[%s219_s25 + $0x8] sm:$0xff] }
   0xf   : > { %v233_v3 = vsub.s32 3, %v229_v1  ;;  %vm239_vm0 = vcmp.lt.s32.totalorder %v229_v1, 3  ;;  %vm242_vm1 = vcmp.ge.s32.totalorder %v229_v1, 3  ;;  %v248_v4 = vsub.s32 0, %v229_v1 }
  0x10   : > { %vm256_vm2 = vcmp.lt.s32.totalorder %v229_v1, 2  ;;  %vm259_vm3 = vcmp.ge.s32.totalorder %v229_v1, 2  ;;  %v265_v5 = vsub.s32 1, %v229_v1  ;;  %vm273_vm4 = vcmp.lt.s32.totalorder %v229_v1, 1 }
  0x11   : > { %v234_v8 = vrot.slane %v227_v2, %v233_v3  ;;  %v249_v9 = vrot.slane %v227_v2, %v248_v4  ;;  %vm276_vm5 = vcmp.ge.s32.totalorder %v229_v1, 1  ;;  %v282_v10 = vsub.s32 2, %v229_v1 }
  0x12   : > { %v237_v11 = vrot.slane %v225_v6, 5  ;;  %v238_v12 = vrot.slane %v226_v7, 5  ;;  %v254_v13 = vrot.slane %v225_v6, 6  ;;  %v255_v14 = vrot.slane %v226_v7, 6 }
  0x13   : > { %v235_v15 = vmul.f32 %v234_v8, %v225_v6  ;;  %v266_v16 = vrot.slane %v227_v2, %v265_v5  ;;  %v271_v17 = vrot.slane %v225_v6, 7  ;;  %v272_v18 = vrot.slane %v226_v7, 7 }
  0x14   : > { %v241_v19 = vsel %vm239_vm0, %v238_v12, %v237_v11  ;;  %v258_v20 = vsel %vm256_vm2, %v255_v14, %v254_v13  ;;  %v283_v21 = vrot.slane %v227_v2, %v282_v10  ;;  %v236_v22 = vmul.f32 %v234_v8, %v226_v7  ;;  %v414_v2 = vld [vmem:[%s524_s4] ss:$0 sm:$0xff] }
  0x15   : > { %v244_v23 = vsel %vm242_vm1, %v241_v19, 0.0  ;;  %v261_v24 = vsel %vm259_vm3, %v258_v20, 0.0  ;;  %v275_v25 = vsel %vm273_vm4, %v272_v18, %v271_v17  ;;  %v240_v26 = vsel %vm239_vm0, %v237_v11, %v238_v12 }
  0x16   : > { %v250_v27 = vmul.f32 %v249_v9, %v244_v23  ;;  %v267_v28 = vmul.f32 %v266_v16, %v261_v24  ;;  %v278_v29 = vsel %vm276_vm5, %v275_v25, 0.0  ;;  %v251_v30 = vmul.f32 %v249_v9, %v240_v26 }
  0x17   : > { %v284_v31 = vmul.f32 %v283_v21, %v278_v29  ;;  %v257_v32 = vsel %vm256_vm2, %v254_v13, %v255_v14  ;;  %v274_v33 = vsel %vm273_vm4, %v271_v17, %v272_v18 }
  0x18   : > { %v252_v34 = vadd.f32 %v250_v27, %v235_v15  ;;  %v253_v35 = vadd.f32 %v251_v30, %v236_v22  ;;  %v268_v36 = vmul.f32 %v266_v16, %v257_v32  ;;  %v285_v37 = vmul.f32 %v283_v21, %v274_v33 }
  0x1a   : > { %v269_v38 = vadd.f32 %v267_v28, %v252_v34  ;;  %v270_v39 = vadd.f32 %v268_v36, %v253_v35 }
  0x1c   : > { %v286_v41 = vadd.f32 %v284_v31, %v269_v38  ;;  %v287_v42 = vadd.f32 %v285_v37, %v270_v39 }
  0x1e   : > { %v295_v43 = vadd.f32 %v412_v40, %v286_v41  ;;  %v296_v44 = vadd.f32 %v412_v40, %v287_v42 }
  0x20   : > { %v298_v45 = vsel %vm297_vm6, %v295_v43, 0.0  ;;  %v301_v46 = vsel %vm297_vm6, %v296_v44, 0.0 }
  0x21   : > { %299 = vadd.xlane.f32.xlu0 %v298_v45 }
  0x25   : > { %302 = vadd.xlane.f32.xlu0 %v301_v46 }
  0xaa   : > { %v300_v47 = vpop.xlane.xlu0 %299 }
  0xab   : > { %v305_v48 = vmul.f32 0.0625, %v300_v47 }
  0xad   : > { %v307_v49 = vsub.f32 %v295_v43, %v305_v48 }
  0xae   : > { %v303_v50 = vpop.xlane.xlu0 %302 }
  0xaf   : > { %v306_v51 = vmul.f32 0.0625, %v303_v50  ;;  %v309_v52 = vmul.f32 %v307_v49, %v307_v49 }
  0xb1   : > { %v308_v53 = vsub.f32 %v296_v44, %v306_v51  ;;  %v311_v54 = vsel %vm297_vm6, %v309_v52, 0.0 }
  0xb2   : > { %312 = vadd.xlane.f32.xlu1 %v311_v54 }
  0xb3   : > { %v310_v55 = vmul.f32 %v308_v53, %v308_v53 }
  0xb5   : > { %v314_v56 = vsel %vm297_vm6, %v310_v55, 0.0 }
  0xb6   : > { %315 = vadd.xlane.f32.xlu1 %v314_v56 }
 0x13b   : > { %v313_v57 = vpop.xlane.xlu1 %312 }
 0x13c   : > { %v317_v58 = vmul.f32 0.0625, %v313_v57 }
 0x13e   : > { %v319_v59 = vadd.f32 1e-05, %v317_v58 }
 0x13f   : > { %v316_v60 = vpop.xlane.xlu1 %315 }
 0x140   : > { %427 = vrsqrt.f32 %v319_v59  ;;  %v318_v61 = vmul.f32 0.0625, %v316_v60 }
 0x142   : > { %v320_v62 = vadd.f32 1e-05, %v318_v61 }
 0x144   : > { %429 = vrsqrt.f32 %v320_v62 }
 0x14d   : > { %v428_v63 = vpop.eup %427 }
 0x14e   : > { %v323_v1 = vmul.f32 %v428_v63, %v307_v49 }
 0x150   : > { %v332_v3 = vmul.f32 %v413_v0, %v323_v1 }
 0x151   : > { %v430_v4 = vpop.eup %429 }
 0x152   : > { %v341_v5 = vadd.f32 %v414_v2, %v332_v3  ;;  %v324_v6 = vmul.f32 %v430_v4, %v308_v53 }
 0x154   : > { %v343_v7 = vsel %vm297_vm6, %v341_v5, %v295_v43  ;;  %v333_v8 = vmul.f32 %v413_v0, %v324_v6 }
 0x155   : > { %346 = vst.msk [vmem:[%s224_s9] sm:$0xff] %vm345_vm7, %v343_v7 }
 0x156   : > { %v342_v9 = vadd.f32 %v414_v2, %v333_v8 }
 0x158   : > { %v344_v10 = vsel %vm297_vm6, %v342_v9, %v296_v44 }
 0x159   : > { %347 = vst.msk [vmem:[%s224_s9 + $0x8] sm:$0xff] %vm345_vm7, %v344_v10 }
 0x15a PF: > { %s15_s18 = sadd.s32 1, %s437_s18  }
 0x15b   : > { %p12_p4 = scmp.ge.s32.totalorder %s15_s18, 4  }
 0x15d   :  { %14 = sbr.rel (!%p12_p4) target bundleno = 1 (0x1), region = 70 }

// kernel: yaad_block_forward.4
= control target key start
LH: loop header
LB: loop body
LE: loop exit
PB: predicated region body
PF: predicated region fallthrough
CT: control target
= control target key end

     0   :  { %s763_s21 = smov 0   ;;  %s820_s0 = inlined_call_operand.vmem [shape: f32[32,32], index: 0, kind: input, shape index: {}]   ;;  %s821_s1 = inlined_call_operand.vmem [shape: f32[1,32], index: 1, kind: input, shape index: {}]   ;;  %s822_s2 = inlined_call_operand.vmem [shape: bf16[32,32], index: 2, kind: input, shape index: {}]   ;;  %s823_s3 = inlined_call_operand.vmem [shape: bf16[32,24], index: 3, kind: input, shape index: {}]   ;;  %s824_s4 = inlined_call_operand.vmem [shape: bf16[24,48], index: 4, kind: input, shape index: {}]   ;;  %s825_s5 = inlined_call_operand.vmem [shape: f32[32,32], index: 5, kind: output, shape index: {0}]   ;;  %s826_s6 = inlined_call_operand.vmem [shape: f32[32,48], index: 6, kind: output, shape index: {1}]  }
   0x1 LB: > { %s624_s22 = sadd.s32 4294967295, %s724_s21   ;;  %p628_p0 = scmp.ge.s32.totalorder %s724_s21, 1  ;;  %s724_s21 = sphi %s763_s21, %s17_s21  }
   0x2   : > { %p216_p1 = scmp.lt.s32.totalorder %s724_s21, 3 }
   0x4   : > { %p217_p2 = pnand %p628_p0, %p216_p1 }
   0x5   : > { %s629_s23 = sshll.u32 (!%p217_p2), %s624_s22, 1 }
   0x6   : > { %220 = sbr.rel (%p217_p2) target bundleno = 624 (0x270), region = 40  ;;  %p252_p3 = scmp.lt.s32.totalorder (!%p217_p2), %s629_s23, 3 }
   0xb   : > { %s828_s23 = smov (!%p252_p3, %s629_s23), 3  ;;  %vm274_vm0 = vcmask 261120   ;;  %v692_v6 = vld [vmem:[%s822_s2 + $0x8] sm:$0xff]   ;;  %v726_v8 = vmov 0.0   ;;  %v694_v9 = vld [vmem:[%s822_s2] sm:$0xff]   ;;  %vm727_vm1 = vmmov 0  }
   0xc   : > { %s771_s24 = sshll.u32 %s828_s23, 3  ;;  %v693_v7 = vld [vmem:[%s823_s3 + $0x8] sm:$0xff]   ;;  %658 = vmatprep.subr.bf16.mxu0 %v726_v8  ;;  %666 = vmatprep.subr.bf16.mxu1 %v726_v8  ;;  %v695_v10 = vld [vmem:[%s823_s3] sm:$0xff]   ;;  %vm436_vm2 = vcmask 1043456   ;;  %vm432_vm3 = vcmask 195584   ;;  %vm531_vm6 = vcmask 392192  }
   0xd   : > { %s255_s27 = scalar_lea.vmem %s820_s0, %s771_s24  ;;  %659 = vmatpush3.bf16.msra.mxu0 %v692_v6  ;;  %667 = vmatpush3.bf16.msra.mxu1 %v693_v7  ;;  %v635_v20 = vld [vmem:[%s821_s1] ss:$0 sm:$0xff]  ;;  %v696_v22 = vld [vmem:[%s824_s4 + $0x8] ss:$0 sps:$4 sm:$0xff]   ;;  %s261_s20 = scalar_lea.vmem %s825_s5, %s771_s24 }
   0xe   : > { %v270_v0 = vld [vmem:[%s255_s27] sm:$0xff]  ;;  %v271_v1 = vld [vmem:[%s255_s27 + $0x8] sm:$0xff]  ;;  %660 = vmatprep.subr.bf16.mxu0 %v726_v8  ;;  %668 = vmatprep.subr.bf16.mxu1 %v726_v8  ;;  %v438_v26 = vsel %vm436_vm2, %v696_v22, 0  ;;  %s267_s25 = scalar_lea.vmem %s826_s6, %s771_s24 }
   0xf   : > { %v272_v2 = vmul.f32 %v270_v0, %v270_v0  ;;  %v273_v3 = vmul.f32 %v271_v1, %v271_v1  ;;  %662 = vmatprep.mubr.msk.bf16.mxu0 %vm727_vm1, %v726_v8  ;;  %670 = vmatprep.mubr.msk.bf16.mxu1 %vm727_vm1, %v726_v8  ;;  %v697_v27 = vld [vmem:[%s824_s4] sm:$0xff]  }
  0x11   : > { %v275_v4 = vsel %vm274_vm0, %v272_v2, 0.0  ;;  %v278_v5 = vsel %vm274_vm0, %v273_v3, 0.0  ;;  %661 = vmatpush3.bf16.msra.mxu0 %v694_v9  ;;  %669 = vmatpush3.bf16.msra.mxu1 %v695_v10 }
  0x12   : > { %276 = vadd.xlane.f32.xlu0 %v275_v4  ;;  %674 = vmatprep.subr.bf16.mxu0 %v726_v8 }
  0x16   : > { %279 = vadd.xlane.f32.xlu0 %v278_v5 }
  0x9b   : > { %v277_v11 = vpop.xlane.xlu0 %276 }
  0x9c   : > { %v282_v12 = vmul.f32 0.03125, %v277_v11 }
  0x9e   : > { %v284_v13 = vadd.f32 1.1920929e-07, %v282_v12 }
  0x9f   : > { %v280_v14 = vpop.xlane.xlu0 %279 }
  0xa0   : > { %698 = vrsqrt.f32 %v284_v13  ;;  %v283_v15 = vmul.f32 0.03125, %v280_v14 }
  0xa2   : > { %v285_v16 = vadd.f32 1.1920929e-07, %v283_v15 }
  0xa4   : > { %700 = vrsqrt.f32 %v285_v16 }
  0xad   : > { %v699_v17 = vpop.eup %698 }
  0xae   : > { %v288_v18 = vmul.f32 %v699_v17, %v270_v0 }
  0xb0   : > { %v297_v23 = vmul.f32 %v635_v20, %v288_v18 }
  0xb1   : > { %v701_v19 = vpop.eup %700 }
  0xb2   : > { %v289_v21 = vmul.f32 %v701_v19, %v271_v1 }
  0xb4   : > { %v298_v24 = vmul.f32 %v635_v20, %v289_v21 }
  0xb6   : > { %v299_v25 = vpack.c.bf16 %v298_v24, %v297_v23 }
  0xb8   : > { %663 = vmatmul.mubr.msk.bf16.vlgmr.msra.gmra.mxu0 %vm274_vm0, %v299_v25  ;;  %671 = vmatmul.mubr.msk.bf16.vlgmr.msra.gmra.mxu1 %vm274_vm0, %v299_v25 }
  0xb9   : > { %675 = vmatpush3.bf16.msra.mxu0 %v438_v26  ;;  %678 = vmatprep.mubr.msk.bf16.mxu0 %vm727_vm1, %v726_v8 }
  0xba   : > { %676 = vmatprep.subr.bf16.mxu0 %v726_v8 }
  0xbd   : > { %677 = vmatpush3.bf16.msra.mxu0 %v697_v27 }
 0x178   : > { %v353_v28 = vpop.f32.mrf.mxu0  ;;  %v412_v29 = vpop.f32.mrf.mxu1 }
 0x179   : > { %360 = vst.msk [vmem:[%s261_s20] sm:$0xff] %vm274_vm0, %v353_v28 }
 0x17a   : > { %v664_v30 = vpop.f32.mrf.mxu0  ;;  %v672_v31 = vpop.f32.mrf.mxu1 }
 0x17c   : > { %v356_v32 = vpop.f32.mrf.mxu0  ;;  %v415_v33 = vpop.f32.mrf.mxu1 }
 0x17d   : > { %361 = vst.msk [vmem:[%s261_s20 + $0x8] sm:$0xff] %vm274_vm0, %v356_v32  ;;  %v419_v34 = vpack.c.bf16 %v415_v33, %v412_v29 }
 0x17e   : > { %v665_v35 = vpop.f32.mrf.mxu0  ;;  %v673_v36 = vpop.f32.mrf.mxu1 }
 0x17f   : > { %679 = vmatmul.mubr.msk.bf16.vlgmr.msra.gmra.mxu0 %vm432_vm3, %v419_v34 }
 0x23f   : > { %v474_v37 = vpop.f32.mrf.mxu0 }
 0x240   : > { %v487_v38 = vand.u32 2147483647, %v474_v37  ;;  %v645_v43 = vmul.f32 -1.442695, %v474_v37  ;;  %v481_v1 = vmax.f32 %v474_v37, 0.0  ;;  %vm483_vm5 = vcmp.ne.f32.partialorder %v474_v37, %v474_v37 }
 0x241   : > { %v680_v39 = vpop.f32.mrf.mxu0 }
 0x242   : > { %v489_v40 = vsub.f32 0.0, %v487_v38 }
 0x243   : > { %v477_v41 = vpop.f32.mrf.mxu0 }
 0x244   : > { %v491_v42 = vmul.f32 1.442695, %v489_v40  ;;  %v488_v44 = vand.u32 2147483647, %v477_v41  ;;  %v646_v48 = vmul.f32 -1.442695, %v477_v41  ;;  %vm484_vm8 = vcmp.ne.f32.partialorder %v477_v41, %v477_v41 }
 0x245   : > { %v681_v45 = vpop.f32.mrf.mxu0  ;;  %v482_v10 = vmax.f32 %v477_v41, 0.0 }
 0x246   : > { %702 = vpow2.f32 %v491_v42  ;;  %v490_v46 = vsub.f32 0.0, %v488_v44 }
 0x247   : > { %704 = vpow2.f32 %v645_v43 }
 0x248   : > { %v493_v47 = vmul.f32 1.442695, %v490_v46 }
 0x24a   : > { %706 = vpow2.f32 %v493_v47 }
 0x24b   : > { %708 = vpow2.f32 %v646_v48 }
 0x253   : > { %v703_v49 = vpop.eup %702 }
 0x254   : > { %v495_v50 = vadd.f32 1.0, %v703_v49  ;;  %v705_v51 = vpop.eup %704  ;;  %v498_v56 = vmul.f32 -0.5, %v703_v49  ;;  %v501_v60 = vand.u32 2147483647, %v703_v49 }
 0x255   : > { %v523_v53 = vadd.f32 1.0, %v705_v51 }
 0x256   : > { %710 = vlog2.f32 %v495_v50  ;;  %v499_v58 = vadd.f32 1.0, %v498_v56  ;;  %vm502_vm4 = vcmp.lt.f32.partialorder %v501_v60, 0.0004427343 }
 0x257   : > { %v707_v52 = vpop.eup %706 }
 0x258   : > { %v504_v54 = vadd.f32 1.0, %v707_v52  ;;  %v709_v55 = vpop.eup %708  ;;  %v507_v59 = vmul.f32 -0.5, %v707_v52  ;;  %v500_v63 = vmul.f32 %v703_v49, %v499_v58  ;;  %v510_v2 = vand.u32 2147483647, %v707_v52 }
 0x259   : > { %v524_v57 = vadd.f32 1.0, %v709_v55 }
 0x25a   : > { %712 = vlog2.f32 %v504_v54  ;;  %v508_v0 = vadd.f32 1.0, %v507_v59  ;;  %vm511_vm7 = vcmp.lt.f32.partialorder %v510_v2, 0.0004427343 }
 0x25b   : > { %714 = vrcp.f32 %v523_v53 }
 0x25c   : > { %716 = vrcp.f32 %v524_v57  ;;  %v509_v7 = vmul.f32 %v707_v52, %v508_v0 }
 0x263   : > { %v711_v61 = vpop.eup %710 }
 0x264   : > { %v497_v62 = vmul.f32 0.6931472, %v711_v61 }
 0x266   : > { %v503_v3 = vsel %vm502_vm4, %v500_v63, %v497_v62 }
 0x267   : > { %v713_v4 = vpop.eup %712  ;;  %v513_v5 = vadd.f32 %v503_v3, %v481_v1 }
 0x268   : > { %v506_v6 = vmul.f32 0.6931472, %v713_v4  ;;  %v715_v8 = vpop.eup %714 }
 0x269   : > { %v515_v9 = vsel %vm483_vm5, %v474_v37, %v513_v5  ;;  %v717_v14 = vpop.eup %716 }
 0x26a   : > { %v529_v11 = vsel %vm274_vm0, %v515_v9, %v715_v8  ;;  %v512_v12 = vsel %vm511_vm7, %v509_v7, %v506_v6 }
 0x26b   : > { %532 = vst.msk [vmem:[%s267_s25] sm:$0xff] %vm531_vm6, %v529_v11  ;;  %v514_v13 = vadd.f32 %v512_v12, %v482_v10 }
 0x26d   : > { %v516_v15 = vsel %vm484_vm8, %v477_v41, %v514_v13 }
 0x26e   : > { %v530_v16 = vsel %vm274_vm0, %v516_v15, %v717_v14 }
 0x26f   : > { %533 = vst.msk [vmem:[%s267_s25 + $0x8] sm:$0xff] %vm531_vm6, %v530_v16 }
 0x270 PF: > { %s17_s21 = sadd.s32 1, %s724_s21  }
 0x271   : > { %p14_p4 = scmp.ge.s32.totalorder %s17_s21, 4  }
 0x273   :  { %16 = sbr.rel (!%p14_p4) target bundleno = 1 (0x1), region = 82 }

// kernel: yaad_block_forward.6
= control target key start
LH: loop header
LB: loop body
LE: loop exit
PB: predicated region body
PF: predicated region fallthrough
CT: control target
= control target key end

     0   :  { %s1419_s21 = smov 0   ;;  %s1421_s22 = smov 0   ;;  %s1644_s0 = inlined_call_operand.vmem [shape: f32[2,16,32], index: 0, kind: input, shape index: {}]   ;;  %s1645_s1 = inlined_call_operand.vmem [shape: f32[2,16,48], index: 1, kind: input, shape index: {}]   ;;  %s1646_s2 = inlined_call_operand.vmem [shape: f32[16,16], index: 2, kind: input, shape index: {}]   ;;  %s1647_s3 = inlined_call_operand.vmem [shape: f32[1,16], index: 3, kind: input, shape index: {}]   ;;  %s1648_s4 = inlined_call_operand.vmem [shape: f32[16,16], index: 4, kind: input, shape index: {}]   ;;  %s1649_s5 = inlined_call_operand.vmem [shape: f32[1,16], index: 5, kind: input, shape index: {}]   ;;  %s1650_s6 = inlined_call_operand.vmem [shape: f32[2,16,16], index: 6, kind: output, shape index: {}]  }
   0x1   :  { %s1423_s23 = smov 0  }
   0x2 LB: > { %s28_s24 = sadd.s32 1, %s1372_s22  ;;  %p1222_p0 = scmp.ge.s32.totalorder %s1376_s23, 1  ;;  %s1376_s23 = sphi %s1423_s23, %s16_s23   ;;  %s1372_s22 = sphi %s1421_s22, %s1652_s22   ;;  %s1368_s21 = sphi %s1419_s21, %s1651_s21  }
   0x3   : > { %p30_p1 = scmp.ge.s32.totalorder %s28_s24, 2  ;;  %p250_p2 = scmp.lt.s32.totalorder %s1376_s23, 3 }
   0x5   : > { %s1654_s24 = smov (%p30_p1, %s28_s24), 0  ;;  %p251_p3 = pnand %p1222_p0, %p250_p2 }
   0x6   : > { %p298_p4 = scmp.lt.s32.totalorder (!%p251_p3), %s1368_s21, 1  ;;  %s1380_s17 = smov (!%p251_p3), 112  }
   0x7   : > { %254 = sbr.rel (%p251_p3) target bundleno = 1747 (0x6d3), region = 44  ;;  %s1382_s28 = smov (!%p251_p3), 16  }
   0x8   : > { %s1383_s29 = smov (!%p251_p3), 32  }
   0xc   : > { %v332_v0 = vld [vmem:[%s1646_s2 + $0x8] sm:$0xff]  ;;  %vm333_vm0 = vcmask 130048   ;;  %v331_v1 = vld [vmem:[%s1646_s2] sm:$0xff]  ;;  %v1378_v2 = vmov 0.0   ;;  %vm1379_vm1 = vmmov 0   ;;  %vm337_vm2 = vcmask 122880  }
   0xd   : > { %1270 = vmatprep.subr.mxu0 %v1378_v2  ;;  %335 = vst.msk [vmem:[#allocation2 + $0x8] sm:$0xff] %vm333_vm0, %v332_v0  ;;  %334 = vst.msk [vmem:[#allocation2] sm:$0xff] %vm333_vm0, %v331_v1  ;;  %1274 = vmatprep.mubr.msk.f32.mxu0 %vm1379_vm1, %v1378_v2  ;;  %v336_v3 = vld [vmem:[%s1647_s3] sm:$0x1]  ;;  %s1656_s21 = smov (!%p298_p4, %s1368_s21), 1  ;;  %v340_v7 = vld [vmem:[%s1648_s4 + $0x8] sm:$0xff]  ;;  %v603_v61 = vlaneseq }
   0xe   : > { %338 = vst.msk [vmem:[#allocation3] sm:$0x1] %vm337_vm2, %v336_v3  ;;  %1277 = vmatprep.subr.mxu1 %v1378_v2  ;;  %1281 = vmatprep.mubr.msk.f32.mxu1 %vm1379_vm1, %v1378_v2  ;;  %s1455_s7 = sshll.u32 %s1656_s21, 4  ;;  %v339_v8 = vld [vmem:[%s1648_s4] sm:$0xff]  ;;  %s1381_s21 = smov 96   ;;  %vm555_vm3 = vcmask 130055  }
   0xf   : > { %s1468_s10 = scalar_lea.vmem %s1644_s0, %s1455_s7  ;;  %342 = vst.msk [vmem:[#allocation4 + $0x8] sm:$0xff] %vm333_vm0, %v340_v7  ;;  %341 = vst.msk [vmem:[#allocation4] sm:$0xff] %vm333_vm0, %v339_v8  ;;  %v343_v11 = vld [vmem:[%s1649_s5] sm:$0x1]  ;;  %s1510_s20 = scalar_lea.vmem %s1645_s1, %s1455_s7  ;;  %v604_v62 = vshrl.u32 %v603_v61, 7 }
  0x10   : > { %v345_v6 = vld [vmem:[%s1468_s10] sm:$0xff]  ;;  %344 = vst.msk [vmem:[#allocation5] sm:$0x1] %vm337_vm2, %v343_v11  ;;  %s1523_s27 = scalar_lea.vmem %s1650_s6, %s1455_s7 }
  0x11   : > { %530 = vrot.lane.b32.xlu0 %v345_v6, %s1380_s17  ;;  %v1513_v21 = vld [vmem:[%s1510_s20] sm:$0xff]  ;;  %v1536_v1 = vsub.s32 7, %v604_v62 }
  0x12   : > { %552 = vrot.lane.b32.xlu1 %v1513_v21, %s1381_s21 }
  0x14   : > { %v1457_v4 = vld [vmem:[#allocation2 + $0x8] sm:$0xff]  ;;  %v1462_v5 = vld [vmem:[#allocation2] sm:$0xff] }
  0x15   : > { %1271 = vmatpush3.xpose.msk.msra.mxu0 %vm333_vm0, %v1457_v4  ;;  %v1500_v12 = vld [vmem:[#allocation3] ss:$0 sm:$0xff] }
  0x16   : > { %1272 = vmatprep.subr.mxu0 %v1378_v2  ;;  %v1485_v9 = vld [vmem:[#allocation4 + $0x8] sm:$0xff]  ;;  %v1490_v10 = vld [vmem:[#allocation4] sm:$0xff]  ;;  %561 = vrot.lane.b32.xlu1 %v1513_v21, %s1380_s17 }
  0x17   : > { %1278 = vmatpush3.xpose.msk.msra.mxu1 %vm333_vm0, %v1485_v9  ;;  %v1233_v22 = vld [vmem:[#allocation5] ss:$0 sm:$0xff] }
  0x18   : > { %1279 = vmatprep.subr.mxu1 %v1378_v2 }
  0x19   : > { %1273 = vmatpush3.xpose.msk.msra.mxu0 %vm333_vm0, %v1462_v5 }
  0x1a   : > { %1284 = vmatprep.subr.mxu0 %v1378_v2 }
  0x1b   : > { %1280 = vmatpush3.xpose.msk.msra.mxu1 %vm333_vm0, %v1490_v10 }
  0x1c   : > { %1275 = vmatmul.mubr.msk.f32.vlgmr.msra.gmra.mxu0 %vm333_vm0, %v345_v6  ;;  %1291 = vmatprep.subr.mxu1 %v1378_v2 }
  0x1d   : > { %1288 = vmatprep.mubr.msk.f32.mxu0 %vm1379_vm1, %v1378_v2 }
  0x83   : > { %v531_v24 = vpop.permute.xlu0 %530 }
  0x84   : > { %v553_v30 = vpop.permute.xlu1 %552 }
  0x85   : > { %v556_v31 = vsel %vm555_vm3, %v553_v30, 0.0 }
  0x86   : > { %557 = vadd.xlane.f32.xlu1 %v556_v31 }
  0x88   : > { %v562_v32 = vpop.permute.xlu1 %561 }
  0x89   : > { %v564_v33 = vsel %vm555_vm3, %v562_v32, 0.0 }
  0xdc   : > { %v435_v13 = vpop.f32.mrf.mxu0 }
  0xdd   : > { %v436_v14 = vadd.f32 %v1500_v12, %v435_v13 }
  0xde   : > { %v1276_v15 = vpop.f32.mrf.mxu0 }
  0xdf   : > { %v440_v16 = vmul.f32 0.70710677, %v436_v14  ;;  %v439_v18 = vmul.f32 0.5, %v436_v14 }
  0xe1   : > { %1342 = verf.f32 %v440_v16 }
  0xee   : > { %v1343_v17 = vpop.eup %1342 }
  0xef   : > { %v442_v19 = vadd.f32 1.0, %v1343_v17 }
  0xf1   : > { %v443_v20 = vmul.f32 %v442_v19, %v439_v18 }
  0xf3   : > { %1282 = vmatmul.mubr.msk.f32.vlgmr.msra.gmra.mxu1 %vm333_vm0, %v443_v20  ;;  %v577_v41 = vsel %vm333_vm0, %v443_v20, 0.0 }
  0xf4   : > { %1295 = vmatprep.mubr.msk.f32.mxu1 %vm1379_vm1, %v1378_v2  ;;  %v578_v42 = vrot.slane %v577_v41, 4 }
  0xf6   : > { %v579_v45 = vadd.f32 %v578_v42, %v577_v41 }
  0xf8   : > { %v580_v49 = vrot.slane %v579_v45, 2 }
  0xfa   : > { %v581_v52 = vadd.f32 %v580_v49, %v579_v45 }
  0xfc   : > { %v582_v56 = vrot.slane %v581_v52, 1 }
  0xfe   : > { %v583_v59 = vadd.f32 %v582_v56, %v581_v52 }
 0x100   : > { %v584_v60 = vmul.f32 0.125, %v583_v59 }
 0x10f   : > { %v558_v63 = vpop.xlane.xlu1 %557 }
 0x110   : > { %v1538_v3 = vmul.f32 0.0625, %v558_v63 }
 0x112   : > { %v606_v7 = vrot.slane %v1538_v3, %v1536_v1 }
 0x114   : > { %v617_v16 = vmul.f32 %v606_v7, %v1490_v10  ;;  %v618_v18 = vmul.f32 %v606_v7, %v1485_v9  ;;  %v608_v10 = vmul.f32 %v606_v7, %v1457_v4  ;;  %v731_v4 = vld [vmem:[%s1468_s10 + $0x8] sm:$0xff] }
 0x1b3   : > { %v525_v23 = vpop.f32.mrf.mxu1 }
 0x1b4   : > { %v526_v25 = vadd.f32 %v1233_v22, %v525_v23 }
 0x1b5   : > { %v1283_v26 = vpop.f32.mrf.mxu1 }
 0x1b6   : > { %529 = vst.msk [vmem:[%s1523_s27] sm:$0xff] %vm333_vm0, %v526_v25  ;;  %v533_v27 = vsub.f32 %v526_v25, %v531_v24 }
 0x1b8   : > { %v534_v28 = vmul.f32 %v533_v27, %v533_v27 }
 0x1ba   : > { %v535_v29 = vsel %vm333_vm0, %v534_v28, 0.0 }
 0x1bb   : > { %536 = vadd.xlane.f32.xlu0 %v535_v29 }
 0x1bf   : > { %565 = vadd.xlane.f32.xlu0 %v564_v33  ;;  %v1569_v33 = vld [vmem:[%s1510_s20 + $0x8] sm:$0xff] }
 0x244   : > { %v537_v34 = vpop.xlane.xlu0 %536 }
 0x245   : > { %1344 = vrsqrt.f32 %v537_v34  ;;  %vm540_vm4 = vcmp.eq.f32.partialorder %v537_v34, inf  ;;  %v543_v37 = vand.u32 2147483648, %v537_v34  ;;  %vm542_vm5 = vcmp.eq.f32.partialorder %v537_v34, 0.0 }
 0x248   : > { %v566_v0 = vpop.xlane.xlu0 %565 }
 0x249   : > { %v1540_v6 = vmul.f32 0.0625, %v566_v0 }
 0x24b   : > { %v612_v13 = vrot.slane %v1540_v6, %v1536_v1 }
 0x252   : > { %v1345_v35 = vpop.eup %1344 }
 0x253   : > { %v539_v36 = vmul.f32 %v1345_v35, %v537_v34 }
 0x255   : > { %v541_v38 = vsel %vm540_vm4, %v537_v34, %v539_v36 }
 0x256   : > { %v544_v39 = vsel %vm542_vm5, %v543_v37, %v541_v38 }
 0x257   : > { %v545_v40 = vadd.f32 1e-09, %v544_v39  ;;  %vm549_vm6 = vcmp.gt.f32.partialorder %v544_v39, %v1513_v21 }
 0x259   : > { %1346 = vrcp.f32 %v545_v40 }
 0x266   : > { %v1347_v43 = vpop.eup %1346 }
 0x267   : > { %v547_v44 = vmul.f32 %v1347_v43, %v533_v27 }
 0x269   : > { %v548_v46 = vmul.f32 %v547_v44, %v1513_v21 }
 0x26b   : > { %v550_v47 = vsel %vm549_vm6, %v548_v46, %v533_v27  ;;  %v607_v27 = vmul.f32 %v606_v7, %v1462_v5 }
 0x26c   : > { %v568_v48 = vsel %vm333_vm0, %v550_v47, 0.0 }
 0x26d   : > { %v569_v50 = vrot.slane %v568_v48, 4 }
 0x26f   : > { %v570_v51 = vadd.f32 %v569_v50, %v568_v48 }
 0x271   : > { %v571_v53 = vrot.slane %v570_v51, 2 }
 0x273   : > { %v572_v54 = vadd.f32 %v571_v53, %v570_v51  ;;  %v718_v53 = vmul.f32 %v1500_v12, %v1538_v3 }
 0x275   : > { %v573_v55 = vrot.slane %v572_v54, 1 }
 0x277   : > { %v574_v57 = vadd.f32 %v573_v55, %v572_v54 }
 0x279   : > { %v576_v58 = vmul.f32 0.125, %v574_v57 }
 0x27b   : > { %595 = vbcast.lane.b32.xlu1 %v576_v58, 256  ;;  %599 = vbcast.lane.b32.xlu0 %v576_v58, 264 }
 0x27f   : > { %586 = vbcast.lane.b32.xlu1 %v584_v60, 256  ;;  %590 = vbcast.lane.b32.xlu0 %v584_v60, 264 }
 0x283   : > { %709 = vrot.lane.b32.xlu0 %v576_v58, %s1382_s28  ;;  %704 = vrot.lane.b32.xlu1 %v1233_v22, %s1383_s29 }
 0x2ed   : > { %v596_v8 = vpop.permute.xlu1 %595  ;;  %v600_v11 = vpop.permute.xlu0 %599 }
 0x2ee   : > { %v601_v14 = vmul.f32 %v596_v8, %v584_v60  ;;  %v602_v15 = vmul.f32 %v600_v11, %v584_v60 }
 0x2f0   : > { %v619_v17 = vmul.f32 %v612_v13, %v601_v14  ;;  %v620_v19 = vmul.f32 %v612_v13, %v602_v15 }
 0x2f1   : > { %v587_v20 = vpop.permute.xlu1 %586  ;;  %v591_v22 = vpop.permute.xlu0 %590 }
 0x2f2   : > { %v621_v23 = vsub.f32 %v617_v16, %v619_v17  ;;  %v622_v24 = vsub.f32 %v618_v18, %v620_v19  ;;  %v592_v25 = vmul.f32 %v587_v20, %v576_v58  ;;  %v593_v26 = vmul.f32 %v591_v22, %v576_v58 }
 0x2f4   : > { %723 = vst.msk [vmem:[#allocation4] sm:$0xff] %vm333_vm0, %v621_v23  ;;  %724 = vst.msk [vmem:[#allocation4 + $0x8] sm:$0xff] %vm333_vm0, %v622_v24  ;;  %v613_v28 = vmul.f32 %v612_v13, %v592_v25  ;;  %v614_v29 = vmul.f32 %v612_v13, %v593_v26  ;;  %1285 = vmatpush3.msra.mxu0 %v622_v24 }
 0x2f5   : > { %1286 = vmatprep.subr.mxu0 %v1378_v2  ;;  %v710_v9 = vpop.permute.xlu0 %709  ;;  %v705_v37 = vpop.permute.xlu1 %704 }
 0x2f6   : > { %v615_v30 = vsub.f32 %v607_v27, %v613_v28  ;;  %v616_v31 = vsub.f32 %v608_v10, %v614_v29  ;;  %v712_v32 = vmul.f32 %v710_v9, %v1513_v21  ;;  %1287 = vmatpush3.msra.mxu0 %v621_v23  ;;  %v707_v38 = vmul.f32 %v705_v37, %v1513_v21 }
 0x2f7   : > { %1289 = vmatmul.mubr.msk.f32.vlgmr.msra.gmra.mxu0 %vm333_vm0, %v550_v47  ;;  %1298 = vmatprep.subr.mxu0 %v1378_v2 }
 0x2f8   : > { %721 = vst.msk [vmem:[#allocation2] sm:$0xff] %vm333_vm0, %v615_v30  ;;  %722 = vst.msk [vmem:[#allocation2 + $0x8] sm:$0xff] %vm333_vm0, %v616_v31  ;;  %714 = vrot.lane.b32.xlu0 %v712_v32, %s1382_s28  ;;  %1302 = vmatprep.mubr.msk.f32.mxu0 %vm1379_vm1, %v1378_v2 }
 0x2fb   : > { %v1562_v5 = vld [vmem:[#allocation4 + $0x8] sm:$0xff]  ;;  %v1573_v35 = vld [vmem:[#allocation4] sm:$0xff] }
 0x2fc   : > { %1299 = vmatpush3.xpose.msk.msra.mxu0 %vm333_vm0, %v1562_v5  ;;  %915 = vrot.lane.b32.xlu0 %v731_v4, %s1380_s17 }
 0x2fd   : > { %1300 = vmatprep.subr.mxu0 %v1378_v2 }
 0x2ff   : > { %v1571_v34 = vld [vmem:[#allocation2 + $0x8] sm:$0xff]  ;;  %v1582_v36 = vld [vmem:[#allocation2] sm:$0xff] }
 0x300   : > { %1292 = vmatpush3.xpose.msk.msra.mxu1 %vm333_vm0, %v1571_v34  ;;  %1301 = vmatpush3.xpose.msk.msra.mxu0 %vm333_vm0, %v1573_v35 }
 0x301   : > { %937 = vrot.lane.b32.xlu0 %v1569_v33, %s1381_s21  ;;  %1293 = vmatprep.subr.mxu1 %v1378_v2 }
 0x304   : > { %1294 = vmatpush3.xpose.msk.msra.mxu1 %vm333_vm0, %v1582_v36 }
 0x305   : > { %944 = vrot.lane.b32.xlu0 %v1569_v33, %s1380_s17  ;;  %1305 = vmatprep.subr.mxu1 %v1378_v2 }
 0x307   : > { %1296 = vmatmul.mubr.msk.f32.vlgmr.msra.gmra.mxu1 %vm333_vm0, %v731_v4 }
 0x308   : > { %1309 = vmatprep.mubr.msk.f32.mxu1 %vm1379_vm1, %v1378_v2 }
 0x36a   : > { %v715_v39 = vpop.permute.xlu0 %714 }
 0x36b   : > { %v717_v40 = vsub.f32 %v707_v38, %v715_v39 }
 0x36d   : > { %727 = vrot.lane.b32.xlu1 %v717_v40, %s1381_s21 }
 0x36e   : > { %v916_v41 = vpop.permute.xlu0 %915 }
 0x373   : > { %v938_v42 = vpop.permute.xlu0 %937 }
 0x374   : > { %v940_v43 = vsel %vm555_vm3, %v938_v42, 0.0 }
 0x375   : > { %941 = vadd.xlane.f32.xlu0 %v940_v43 }
 0x377   : > { %v945_v15 = vpop.permute.xlu0 %944 }
 0x378   : > { %v947_v16 = vsel %vm555_vm3, %v945_v15, 0.0 }
 0x3b7   : > { %v692_v44 = vpop.f32.mrf.mxu0 }
 0x3b8   : > { %v696_v45 = vsel %vm333_vm0, %v692_v44, 0.0 }
 0x3b9   : > { %v697_v46 = vrot.slane %v696_v45, 4  ;;  %v1290_v47 = vpop.f32.mrf.mxu0 }
 0x3bb   : > { %v698_v48 = vadd.f32 %v697_v46, %v696_v45 }
 0x3bd   : > { %v699_v49 = vrot.slane %v698_v48, 2 }
 0x3bf   : > { %v700_v50 = vadd.f32 %v699_v49, %v698_v48 }
 0x3c1   : > { %v701_v51 = vrot.slane %v700_v50, 1 }
 0x3c3   : > { %v702_v52 = vadd.f32 %v701_v51, %v700_v50 }
 0x3c5   : > { %v703_v21 = vmul.f32 0.125, %v702_v52 }
 0x3c7   : > { %v719_v54 = vmul.f32 %v703_v21, %v1540_v6  ;;  %v820_v55 = vpop.f32.mrf.mxu1 }
 0x3c9   : > { %v720_v56 = vsub.f32 %v718_v53, %v719_v54  ;;  %v1297_v57 = vpop.f32.mrf.mxu1 }
 0x3cb   : > { %725 = vst.msk [vmem:[#allocation3 - $0x7] sm:$0x80] %vm555_vm3, %v720_v56 }
 0x3d2   : > { %v1600_v58 = vld [vmem:[#allocation3] ss:$0 sm:$0xff] }
 0x3d3   : > { %v821_v59 = vadd.f32 %v1600_v58, %v820_v55 }
 0x3d5   : > { %v825_v60 = vmul.f32 0.70710677, %v821_v59  ;;  %v824_v63 = vmul.f32 0.5, %v821_v59 }
 0x3d7   : > { %1348 = verf.f32 %v825_v60 }
 0x3df   : > { %v728_v61 = vpop.permute.xlu1 %727 }
 0x3e0   : > { %730 = vst.msk [vmem:[#allocation5 - $0x7] sm:$0x80] %vm555_vm3, %v728_v61 }
 0x3e4   : > { %v1349_v62 = vpop.eup %1348 }
 0x3e5   : > { %v827_v12 = vadd.f32 1.0, %v1349_v62 }
 0x3e7   : > { %v828_v0 = vmul.f32 %v827_v12, %v824_v63  ;;  %v1242_v3 = vld [vmem:[#allocation5] ss:$0 sm:$0xff] }
 0x3e9   : > { %1303 = vmatmul.mubr.msk.f32.vlgmr.msra.gmra.mxu0 %vm333_vm0, %v828_v0  ;;  %v959_v28 = vsel %vm333_vm0, %v828_v0, 0.0 }
 0x3ea   : > { %v960_v9 = vrot.slane %v959_v28, 4 }
 0x3ec   : > { %v961_v32 = vadd.f32 %v960_v9, %v959_v28 }
 0x3ee   : > { %v962_v38 = vrot.slane %v961_v32, 2 }
 0x3fe   : > { %v942_v46 = vpop.xlane.xlu0 %941 }
 0x3ff   : > { %v943_v48 = vmul.f32 0.0625, %v942_v46 }
 0x401   : > { %v988_v50 = vrot.slane %v943_v48, %v1536_v1 }
 0x403   : > { %v999_v55 = vmul.f32 %v988_v50, %v1573_v35  ;;  %v1000_v57 = vmul.f32 %v988_v50, %v1562_v5  ;;  %v989_v12 = vmul.f32 %v988_v50, %v1582_v36 }
 0x4a9   : > { %v910_v6 = vpop.f32.mrf.mxu0 }
 0x4aa   : > { %v911_v7 = vadd.f32 %v1242_v3, %v910_v6 }
 0x4ab   : > { %v1304_v8 = vpop.f32.mrf.mxu0 }
 0x4ac   : > { %914 = vst.msk [vmem:[%s1523_s27 + $0x8] sm:$0xff] %vm333_vm0, %v911_v7  ;;  %v918_v11 = vsub.f32 %v911_v7, %v916_v41  ;;  %v963_v41 = vadd.f32 %v962_v38, %v961_v32 }
 0x4ae   : > { %v919_v13 = vmul.f32 %v918_v11, %v918_v11  ;;  %v964_v43 = vrot.slane %v963_v41, 1 }
 0x4b0   : > { %v920_v14 = vsel %vm333_vm0, %v919_v13, 0.0  ;;  %v965_v44 = vadd.f32 %v964_v43, %v963_v41  ;;  %v990_v13 = vmul.f32 %v988_v50, %v1571_v34 }
 0x4b1   : > { %921 = vadd.xlane.f32.xlu1 %v920_v14 }
 0x4b2   : > { %v966_v45 = vmul.f32 0.125, %v965_v44 }
 0x4b5   : > { %948 = vadd.xlane.f32.xlu1 %v947_v16 }
 0x53a   : > { %v922_v17 = vpop.xlane.xlu1 %921 }
 0x53b   : > { %1350 = vrsqrt.f32 %v922_v17  ;;  %vm925_vm7 = vcmp.eq.f32.partialorder %v922_v17, inf  ;;  %v928_v20 = vand.u32 2147483648, %v922_v17  ;;  %vm927_vm8 = vcmp.eq.f32.partialorder %v922_v17, 0.0 }
 0x53e   : > { %v949_v47 = vpop.xlane.xlu1 %948 }
 0x53f   : > { %v950_v49 = vmul.f32 0.0625, %v949_v47 }
 0x541   : > { %v994_v21 = vrot.slane %v950_v49, %v1536_v1 }
 0x548   : > { %v1351_v18 = vpop.eup %1350 }
 0x549   : > { %v924_v19 = vmul.f32 %v1351_v18, %v922_v17 }
 0x54b   : > { %v926_v22 = vsel %vm925_vm7, %v922_v17, %v924_v19 }
 0x54c   : > { %v929_v23 = vsel %vm927_vm8, %v928_v20, %v926_v22 }
 0x54d   : > { %v930_v24 = vadd.f32 1e-09, %v929_v23  ;;  %vm934_vm9 = vcmp.gt.f32.partialorder %v929_v23, %v1569_v33 }
 0x54f   : > { %1352 = vrcp.f32 %v930_v24 }
 0x55c   : > { %v1353_v25 = vpop.eup %1352 }
 0x55d   : > { %v932_v26 = vmul.f32 %v1353_v25, %v918_v11  ;;  %v1100_v25 = vmul.f32 %v1600_v58, %v943_v48 }
 0x55f   : > { %v933_v27 = vmul.f32 %v932_v26, %v1569_v33 }
 0x561   : > { %v935_v10 = vsel %vm934_vm9, %v933_v27, %v918_v11 }
 0x562   : > { %v951_v29 = vsel %vm333_vm0, %v935_v10, 0.0 }
 0x563   : > { %v952_v30 = vrot.slane %v951_v29, 4 }
 0x565   : > { %v953_v31 = vadd.f32 %v952_v30, %v951_v29 }
 0x567   : > { %v954_v4 = vrot.slane %v953_v31, 2 }
 0x569   : > { %v955_v37 = vadd.f32 %v954_v4, %v953_v31 }
 0x56b   : > { %v956_v39 = vrot.slane %v955_v37, 1 }
 0x56d   : > { %v957_v40 = vadd.f32 %v956_v39, %v955_v37 }
 0x56f   : > { %v958_v42 = vmul.f32 0.125, %v957_v40 }
 0x571   : > { %977 = vbcast.lane.b32.xlu0 %v958_v42, 256  ;;  %981 = vbcast.lane.b32.xlu1 %v958_v42, 264 }
 0x575   : > { %1091 = vrot.lane.b32.xlu1 %v958_v42, %s1382_s28 }
 0x579   : > { %1086 = vrot.lane.b32.xlu1 %v1242_v3, %s1383_s29 }
 0x57d   : > { %968 = vbcast.lane.b32.xlu1 %v966_v45, 256 }
 0x5e3   : > { %v978_v51 = vpop.permute.xlu0 %977  ;;  %v982_v52 = vpop.permute.xlu1 %981 }
 0x5e4   : > { %v983_v53 = vmul.f32 %v978_v51, %v966_v45  ;;  %v984_v54 = vmul.f32 %v982_v52, %v966_v45 }
 0x5e6   : > { %v1001_v56 = vmul.f32 %v994_v21, %v983_v53  ;;  %v1002_v59 = vmul.f32 %v994_v21, %v984_v54 }
 0x5e7   : > { %v1092_v60 = vpop.permute.xlu1 %1091 }
 0x5e8   : > { %v1003_v61 = vsub.f32 %v999_v55, %v1001_v56  ;;  %v1004_v62 = vsub.f32 %v1000_v57, %v1002_v59  ;;  %v1094_v63 = vmul.f32 %v1092_v60, %v1569_v33 }
 0x5ea   : > { %1105 = vst.msk [vmem:[#allocation4] sm:$0xff] %vm333_vm0, %v1003_v61  ;;  %1106 = vst.msk [vmem:[#allocation4 + $0x8] sm:$0xff] %vm333_vm0, %v1004_v62  ;;  %1306 = vmatpush3.msra.mxu1 %v1004_v62  ;;  %1096 = vrot.lane.b32.xlu0 %v1094_v63, %s1382_s28 }
 0x5eb   : > { %1307 = vmatprep.subr.mxu1 %v1378_v2  ;;  %v1087_v1 = vpop.permute.xlu1 %1086 }
 0x5ec   : > { %1308 = vmatpush3.msra.mxu1 %v1003_v61  ;;  %v1089_v6 = vmul.f32 %v1087_v1, %v1569_v33 }
 0x5ed   : > { %1310 = vmatmul.mubr.msk.f32.vlgmr.msra.gmra.mxu1 %vm333_vm0, %v935_v10 }
 0x5ee   : > { %972 = vbcast.lane.b32.xlu0 %v966_v45, 264 }
 0x5ef   : > { %v969_v5 = vpop.permute.xlu1 %968 }
 0x5f0   : > { %v974_v35 = vmul.f32 %v969_v5, %v958_v42 }
 0x5f2   : > { %v995_v0 = vmul.f32 %v994_v21, %v974_v35 }
 0x5f4   : > { %v997_v3 = vsub.f32 %v989_v12, %v995_v0 }
 0x5f6   : > { %1103 = vst.msk [vmem:[#allocation2] sm:$0xff] %vm333_vm0, %v997_v3 }
 0x65c   : > { %v1097_v7 = vpop.permute.xlu0 %1096 }
 0x65d   : > { %v1099_v8 = vsub.f32 %v1089_v6, %v1097_v7 }
 0x65f   : > { %1109 = vrot.lane.b32.xlu1 %v1099_v8, %s1381_s21 }
 0x660   : > { %v973_v2 = vpop.permute.xlu0 %972 }
 0x661   : > { %v975_v11 = vmul.f32 %v973_v2, %v958_v42 }
 0x663   : > { %v996_v14 = vmul.f32 %v994_v21, %v975_v11 }
 0x665   : > { %v998_v15 = vsub.f32 %v990_v13, %v996_v14 }
 0x667   : > { %1104 = vst.msk [vmem:[#allocation2 + $0x8] sm:$0xff] %vm333_vm0, %v998_v15 }
 0x6ad   : > { %v1074_v16 = vpop.f32.mrf.mxu1 }
 0x6ae   : > { %v1078_v36 = vsel %vm333_vm0, %v1074_v16, 0.0 }
 0x6af   : > { %v1079_v17 = vrot.slane %v1078_v36, 4  ;;  %v1311_v18 = vpop.f32.mrf.mxu1 }
 0x6b1   : > { %v1080_v19 = vadd.f32 %v1079_v17, %v1078_v36 }
 0x6b3   : > { %v1081_v20 = vrot.slane %v1080_v19, 2 }
 0x6b5   : > { %v1082_v33 = vadd.f32 %v1081_v20, %v1080_v19 }
 0x6b7   : > { %v1083_v22 = vrot.slane %v1082_v33, 1 }
 0x6b9   : > { %v1084_v23 = vadd.f32 %v1083_v22, %v1082_v33 }
 0x6bb   : > { %v1085_v24 = vmul.f32 0.125, %v1084_v23 }
 0x6bd   : > { %v1101_v26 = vmul.f32 %v1085_v24, %v950_v49 }
 0x6bf   : > { %v1102_v27 = vsub.f32 %v1100_v25, %v1101_v26 }
 0x6c1   : > { %1107 = vst.msk [vmem:[#allocation3 - $0x7] sm:$0x80] %vm555_vm3, %v1102_v27 }
 0x6d1   : > { %v1110_v34 = vpop.permute.xlu1 %1109 }
 0x6d2   : > { %1112 = vst.msk [vmem:[#allocation5 - $0x7] sm:$0x80] %vm555_vm3, %v1110_v34 }
 0x6d3 PF: > { %s16_s23 = sadd.s32 1, %s1376_s23   ;;  %s1651_s21 = smov %s1372_s22 }
 0x6d4   : > { %p13_p5 = scmp.ge.s32.totalorder %s16_s23, 4   ;;  %s1652_s22 = smov %s1654_s24 }
 0x6d6   :  { %15 = sbr.rel (!%p13_p5) target bundleno = 2 (0x2), region = 81 }

// kernel: yaad_block_forward.7
= control target key start
LH: loop header
LB: loop body
LE: loop exit
PB: predicated region body
PF: predicated region fallthrough
CT: control target
= control target key end

     0   :  { %14 = vsyncpa [#allocation5], 0  ;;  %s1544_s0 = inlined_call_operand.vmem [shape: f32[32,32], index: 0, kind: input, shape index: {}]   ;;  %s1545_s1 = inlined_call_operand.vmem [shape: f32[32,16], index: 1, kind: input, shape index: {}]   ;;  %s1546_s2 = inlined_call_operand.vmem [shape: f32[1,32], index: 2, kind: input, shape index: {}]   ;;  %s1547_s3 = inlined_call_operand.vmem [shape: bf16[32,32], index: 3, kind: input, shape index: {}]   ;;  %s1548_s4 = inlined_call_operand.vmem [shape: bf16[16,32], index: 4, kind: input, shape index: {}]   ;;  %s1549_s5 = inlined_call_operand.vmem [shape: f32[1,32], index: 5, kind: input, shape index: {}]   ;;  %s1550_s6 = inlined_call_operand.vmem [shape: bf16[32,64], index: 6, kind: input, shape index: {}]   ;;  %s1551_s7 = inlined_call_operand.vmem [shape: bf16[32,64], index: 7, kind: input, shape index: {}]   ;;  %s1552_s8 = inlined_call_operand.vmem [shape: bf16[64,32], index: 8, kind: input, shape index: {}]   ;;  %s1553_s9 = inlined_call_operand.hbm [shape: f32[32,32], index: 9, kind: output, shape index: {}]  }
   0x1   :  { %16 = vsyncpa [#allocation5 + $0x1], 0  ;;  %s1320_s30 = smov 0   ;;  %s1322_s10 = smov 0  }
   0x2   :  { %s1324_s11 = smov 0   ;;  %s1326_s12 = smov 0  }
   0x3   :  { %s1328_s13 = smov 0   ;;  %s1330_s14 = smov 0  }
   0x4 LB: > { %s994_s15 = sadd.s32 4294967295, %s1263_s14   ;;  %s995_s16 = sadd.s32 4294967294, %s1263_s14   ;;  %s1263_s14 = sphi %s1330_s14, %s22_s14   ;;  %s1259_s13 = sphi %s1328_s13, %s1560_s13   ;;  %s1255_s12 = sphi %s1326_s12, %s1559_s12   ;;  %s1251_s11 = sphi %s1324_s11, %s1558_s11   ;;  %s1247_s10 = sphi %s1322_s10, %s1557_s10   ;;  %s1243_s30 = sphi %s1320_s30, %s1556_s30  }
   0x5   : > { %s34_s17 = sadd.s32 1, %s1259_s13  ;;  %s255_s18 = sadd.s32 1, %s1251_s11 }
   0x6   : > { %p36_p0 = scmp.ge.s32.totalorder %s34_s17, 2  ;;  %p265_p1 = scmp.ne.s32.totalorder %s1251_s11, %s1247_s10 }
   0x7   : > { %p266_p2 = scmp.eq.s32.totalorder %s994_s15, 1  ;;  %p271_p3 = scmp.ne.s32.totalorder %s1247_s10, %s1243_s30 }
   0x8   : > { %s1562_s17 = smov (%p36_p0, %s34_s17), 0  ;;  %p272_p5 = scmp.eq.s32.totalorder %s995_s16, 1 }
   0x9   : > { %p1360_p4 = por %p266_p2, %p265_p1  ;;  %s252_s20 = ssub.s32 %s1259_s13, %s1562_s17 }
   0xa   : > { %p1001_p6 = scmp.ge.s32.totalorder %s1263_s14, 1  ;;  %p253_p7 = scmp.eq.s32.totalorder %s252_s20, 0 }
   0xb   : > { %p1367_p8 = por %p272_p5, %p271_p3  ;;  %p343_p9 = scmp.lt.s32.totalorder %s1263_s14, 3 }
   0xc   : > { %s1373_s22 = scalar_select %p253_p7, %s1251_s11, %s255_s18  }
   0xd   : > { %p344_p10 = pnand %p1001_p6, %p343_p9 }
   0xe   : > { %s1003_s23 = sshll.u32 (!%p344_p10), %s1255_s12, 1  ;;  %s394_s26 = sand.u32 (!%p344_p10), 1, %s1247_s10  }
   0xf   : > { %347 = sbr.rel (%p344_p10) target bundleno = 1057 (0x421), region = 56  ;;  %p398_p11 = scmp.lt.s32.totalorder (!%p344_p10), %s1003_s23, 3 }
  0x10   : > { %s1034_s28 = sshll.u32 (!%p344_p10), %s1255_s12, 8  ;;  %s1499_s12 = scalar_lea.sflag (!%p344_p10), [#allocation5], %s394_s26 }
  0x11   : > { %s1493_s16 = scalar_lea.hbm (!%p344_p10), %s1553_s9, %s1034_s28  ;;  %s1267_s20 = smov (!%p344_p10), [#allocation4]  }
  0x12   : > { %s1191_s25 = sshll.u32 (!%p344_p10), %s1267_s20, 4  ;;  %s1192_s25 = int_to_ptr.vmem [resolvable:$false] %s1191_s25 }
  0x14   : > { %s1564_s23 = smov (!%p398_p11, %s1003_s23), 3  ;;  %vm433_vm0 = vcmask 261120   ;;  %v1152_v6 = vld [vmem:[%s1547_s3 + $0x8] sm:$0xff]   ;;  %v1265_v7 = vmov 0.0   ;;  %vm1266_vm1 = vmmov 0   ;;  %v1153_v8 = vld [vmem:[%s1547_s3] sm:$0xff]  }
  0x15   : > { %s1004_s24 = sshll.u32 %s1564_s23, 3  ;;  %1051 = vmatprep.subr.bf16.mxu0 %v1265_v7  ;;  %593 = vst.msk [vmem:[#allocation3] sm:$0xff] %vm433_vm0, %v1265_v7  ;;  %594 = vst.msk [vmem:[#allocation3 + $0x8] sm:$0xff] %vm433_vm0, %v1265_v7  ;;  %1055 = vmatprep.mubr.msk.bf16.mxu0 %vm1266_vm1, %v1265_v7  ;;  %v1007_v18 = vld [vmem:[%s1546_s2] ss:$0 sm:$0xff]  ;;  %vm542_vm2 = vcmask 130048  }
  0x16   : > { %s401_s27 = scalar_lea.vmem %s1544_s0, %s1004_s24  ;;  %1052 = vmatpush3.bf16.msra.mxu0 %v1152_v6  ;;  %1065 = vmatprep.subr.bf16.mxu1 %v1265_v7  ;;  %v1154_v22 = vld [vmem:[%s1548_s4] sm:$0xff]   ;;  %s407_s29 = scalar_lea.vmem %s1545_s1, %s1004_s24  ;;  %v1155_v53 = vld [vmem:[%s1550_s6 + $0x8] sm:$0xff]   ;;  %vm793_vm3 = vcmask 523264  }
  0x17   : > { %v1384_v0 = vld [vmem:[%s401_s27] sm:$0xff]  ;;  %v1388_v2 = vld [vmem:[%s401_s27 + $0x8] sm:$0xff]  ;;  %1053 = vmatprep.subr.bf16.mxu0 %v1265_v7  ;;  %1069 = vmatprep.mubr.msk.bf16.mxu1 %vm1266_vm1, %v1265_v7  ;;  %s1002_s27 = sshll.u32 %s394_s26, 4 }
  0x18   : > { %v431_v1 = vmul.f32 %v1384_v0, %v1384_v0  ;;  %v432_v3 = vmul.f32 %v1388_v2, %v1388_v2  ;;  %v531_v24 = vld [vmem:[%s407_s29] sm:$0xff]  ;;  %v532_v25 = vld [vmem:[%s407_s29 + $0x8] sm:$0xff]  ;;  %1066 = vmatpush3.bf16.msra.mxu1 %v1155_v53  ;;  %s396_s29 = scalar_lea.vmem [#allocation4], %s1002_s27  ;;  %s1193_s27 = scalar_lea.vmem %s1192_s25, 512 }
  0x19   : > { %v533_v26 = vpack.c.bf16 %v532_v25, %v531_v24  ;;  %v1156_v54 = vld [vmem:[%s1551_s7 + $0x8] sm:$0xff]   ;;  %v1157_v55 = vld [vmem:[%s1550_s6] sm:$0xff]   ;;  %1067 = vmatprep.subr.bf16.mxu1 %v1265_v7  ;;  %s867_s23 = sshll.u32 %s396_s29, 4  ;;  %s1495_s23 = int_to_ptr.vmem [resolvable:$true] %s867_s23 }
  0x1a   : > { %v434_v4 = vsel %vm433_vm0, %v431_v1, 0.0  ;;  %v437_v5 = vsel %vm433_vm0, %v432_v3, 0.0  ;;  %1054 = vmatpush3.bf16.msra.mxu0 %v1153_v8  ;;  %v1158_v56 = vld [vmem:[%s1551_s7] sm:$0xff]   ;;  %v1159_v8 = vld [vmem:[%s1552_s8 + $0x18] sm:$0xff]   ;;  %s1187_s18 = scalar_lea.vmem %s1495_s23, 256  ;;  %p1194_p1 = scmp.lt.s32.totalorder %s1495_s23, %s1192_s25 }
  0x1b   : > { %435 = vadd.xlane.f32.xlu0 %v434_v4  ;;  %1059 = vmatprep.subr.bf16.mxu0 %v1265_v7  ;;  %p1188_p12 = scmp.ne.s32.totalorder %s1495_s23, %s1187_s18  ;;  %p1195_p2 = scmp.lt.s32.totalorder %s1193_s27, %s1187_s18 }
  0x1c   : > { %1068 = vmatpush3.bf16.msra.mxu1 %v1157_v55 }
  0x1d   : > { %1081 = vmatprep.subr.bf16.mxu1 %v1265_v7  ;;  %p1189_p13 = pnand %p1188_p12, %p1360_p4  ;;  %p1196_p3 = por %p1195_p2, %p1194_p1 }
  0x1f   : > { %438 = vadd.xlane.f32.xlu0 %v437_v5  ;;  %p1190_p0 = pneg %p1189_p13 }
  0x21   : > { %p1197_p5 = pnand %p1196_p3, %p1190_p0 }
  0xa4   : > { %v436_v9 = vpop.xlane.xlu0 %435 }
  0xa5   : > { %v441_v10 = vmul.f32 0.03125, %v436_v9  ;;  %v1160_v9 = vld [vmem:[%s1552_s8 + $0x10] sm:$0xff]  }
  0xa7   : > { %v443_v11 = vadd.f32 1.1920929e-07, %v441_v10  ;;  %v1161_v10 = vld [vmem:[%s1552_s8 + $0x8] sm:$0xff]  }
  0xa8   : > { %v439_v12 = vpop.xlane.xlu0 %438 }
  0xa9   : > { %1163 = vrsqrt.f32 %v443_v11  ;;  %v442_v13 = vmul.f32 0.03125, %v439_v12  ;;  %v1162_v11 = vld [vmem:[%s1552_s8] sm:$0xff]  }
  0xab   : > { %v444_v14 = vadd.f32 1.1920929e-07, %v442_v13 }
  0xad   : > { %1165 = vrsqrt.f32 %v444_v14 }
  0xb6   : > { %v1164_v15 = vpop.eup %1163 }
  0xb7   : > { %v447_v16 = vmul.f32 %v1164_v15, %v1384_v0 }
  0xb9   : > { %v456_v20 = vmul.f32 %v1007_v18, %v447_v16 }
  0xba   : > { %v1166_v17 = vpop.eup %1165 }
  0xbb   : > { %v448_v19 = vmul.f32 %v1166_v17, %v1388_v2 }
  0xbd   : > { %v457_v21 = vmul.f32 %v1007_v18, %v448_v19 }
  0xbf   : > { %v458_v23 = vpack.c.bf16 %v457_v21, %v456_v20 }
  0xc1   : > { %1056 = vmatmul.mubr.msk.bf16.vlgmr.msra.gmra.mxu0 %vm433_vm0, %v458_v23 }
  0xc2   : > { %1060 = vmatpush3.bf16.msra.mxu0 %v1154_v22  ;;  %1061 = vmatprep.mubr.msk.bf16.mxu0 %vm1266_vm1, %v1265_v7 }
  0xc3   : > { %1073 = vmatprep.subr.bf16.mxu0 %v1265_v7 }
  0xc9   : > { %1062 = vmatmul.mubr.msk.bf16.vlgmr.msra.gmra.mxu0 %vm542_vm2, %v533_v26 }
  0xca   : > { %1077 = vmatprep.mubr.msk.bf16.mxu0 %vm1266_vm1, %v1265_v7  ;;  %1074 = vmatpush3.bf16.msra.mxu0 %v1156_v54 }
  0xcb   : > { %1075 = vmatprep.subr.bf16.mxu0 %v1265_v7 }
  0xce   : > { %1076 = vmatpush3.bf16.msra.mxu0 %v1158_v56 }
 0x181   : > { %v512_v27 = vpop.f32.mrf.mxu0 }
 0x182   : > { %v1011_v28 = vmul.f32 -1.442695, %v512_v27 }
 0x183   : > { %v1057_v29 = vpop.f32.mrf.mxu0 }
 0x184   : > { %1167 = vpow2.f32 %v1011_v28 }
 0x185   : > { %v515_v30 = vpop.f32.mrf.mxu0 }
 0x186   : > { %v1012_v31 = vmul.f32 -1.442695, %v515_v30 }
 0x187   : > { %v1058_v32 = vpop.f32.mrf.mxu0 }
 0x188   : > { %1169 = vpow2.f32 %v1012_v31  ;;  %v759_v32 = vld [vmem:[#allocation3] sm:$0xff] }
 0x189   : > { %v580_v33 = vpop.f32.mrf.mxu0 }
 0x18b   : > { %v1063_v34 = vpop.f32.mrf.mxu0 }
 0x18d   : > { %v583_v35 = vpop.f32.mrf.mxu0 }
 0x18f   : > { %v1064_v36 = vpop.f32.mrf.mxu0 }
 0x190   : > { %v760_v36 = vld [vmem:[#allocation3 + $0x8] sm:$0xff] }
 0x191   : > { %v1168_v37 = vpop.eup %1167 }
 0x192   : > { %v525_v38 = vadd.f32 1.0, %v1168_v37 }
 0x194   : > { %1171 = vrcp.f32 %v525_v38 }
 0x195   : > { %v1170_v39 = vpop.eup %1169 }
 0x196   : > { %v526_v40 = vadd.f32 1.0, %v1170_v39 }
 0x198   : > { %1173 = vrcp.f32 %v526_v40 }
 0x1a1   : > { %v1172_v41 = vpop.eup %1171 }
 0x1a2   : > { %v587_v42 = vmul.f32 %v1172_v41, %v580_v33 }
 0x1a4   : > { %v589_v43 = vadd.f32 %v587_v42, %v1384_v0 }
 0x1a5   : > { %v1174_v44 = vpop.eup %1173 }
 0x1a6   : > { %591 = vst.msk [vmem:[#allocation2] sm:$0xff] %vm433_vm0, %v589_v43  ;;  %v588_v45 = vmul.f32 %v1174_v44, %v583_v35 }
 0x1a8   : > { %v590_v46 = vadd.f32 %v588_v45, %v1388_v2  ;;  %v1015_v2 = vld [vmem:[%s1549_s5] ss:$0 sm:$0xff] }
 0x1aa   : > { %592 = vst.msk [vmem:[#allocation2 + $0x8] sm:$0xff] %vm433_vm0, %v590_v46 }
 0x1ad   : > { %v1435_v47 = vld [vmem:[#allocation2] sm:$0xff] }
 0x1ae   : > { %v597_v48 = vmul.f32 %v1435_v47, %v1435_v47 }
 0x1b0   : > { %v600_v49 = vsel %vm433_vm0, %v597_v48, 0.0 }
 0x1b1   : > { %601 = vadd.xlane.f32.xlu1 %v600_v49  ;;  %v1440_v50 = vld [vmem:[#allocation2 + $0x8] sm:$0xff] }
 0x1b2   : > { %v598_v51 = vmul.f32 %v1440_v50, %v1440_v50 }
 0x1b4   : > { %v603_v52 = vsel %vm433_vm0, %v598_v51, 0.0 }
 0x1b5   : > { %604 = vadd.xlane.f32.xlu1 %v603_v52 }
 0x23a   : > { %v602_v57 = vpop.xlane.xlu1 %601 }
 0x23b   : > { %v607_v58 = vmul.f32 0.03125, %v602_v57 }
 0x23d   : > { %v609_v59 = vadd.f32 1.1920929e-07, %v607_v58 }
 0x23e   : > { %v605_v60 = vpop.xlane.xlu1 %604 }
 0x23f   : > { %1175 = vrsqrt.f32 %v609_v59  ;;  %v608_v61 = vmul.f32 0.03125, %v605_v60 }
 0x241   : > { %v610_v62 = vadd.f32 1.1920929e-07, %v608_v61 }
 0x243   : > { %1177 = vrsqrt.f32 %v610_v62 }
 0x24c   : > { %v1176_v63 = vpop.eup %1175 }
 0x24d   : > { %v613_v0 = vmul.f32 %v1176_v63, %v1435_v47 }
 0x24f   : > { %v622_v4 = vmul.f32 %v1015_v2, %v613_v0 }
 0x250   : > { %v1178_v1 = vpop.eup %1177 }
 0x251   : > { %v614_v3 = vmul.f32 %v1178_v1, %v1440_v50 }
 0x253   : > { %v623_v5 = vmul.f32 %v1015_v2, %v614_v3 }
 0x255   : > { %v624_v6 = vpack.c.bf16 %v623_v5, %v622_v4 }
 0x257   : > { %1070 = vmatmul.mubr.msk.bf16.vlgmr.msra.gmra.mxu1 %vm433_vm0, %v624_v6  ;;  %1078 = vmatmul.mubr.msk.bf16.vlgmr.msra.gmra.mxu0 %vm433_vm0, %v624_v6 }
 0x258   : > { %1089 = vmatprep.mubr.msk.bf16.mxu1 %vm1266_vm1, %v1265_v7  ;;  %1082 = vmatpush3.bf16.msra.mxu1 %v1159_v8 }
 0x259   : > { %1083 = vmatprep.subr.bf16.mxu1 %v1265_v7 }
 0x25c   : > { %1084 = vmatpush3.bf16.msra.mxu1 %v1160_v9 }
 0x25d   : > { %1085 = vmatprep.subr.bf16.mxu1 %v1265_v7 }
 0x260   : > { %1086 = vmatpush3.bf16.msra.mxu1 %v1161_v10 }
 0x261   : > { %1087 = vmatprep.subr.bf16.mxu1 %v1265_v7 }
 0x264   : > { %1088 = vmatpush3.bf16.msra.mxu1 %v1162_v11 }
 0x317   : > { %v678_v12 = vpop.f32.mrf.mxu1  ;;  %v735_v13 = vpop.f32.mrf.mxu0 }
 0x318   : > { %v1022_v14 = vmul.f32 -1.442695, %v678_v12 }
 0x319   : > { %v1071_v15 = vpop.f32.mrf.mxu1  ;;  %v1079_v16 = vpop.f32.mrf.mxu0 }
 0x31a   : > { %1179 = vpow2.f32 %v1022_v14 }
 0x31b   : > { %v681_v17 = vpop.f32.mrf.mxu1  ;;  %v738_v18 = vpop.f32.mrf.mxu0 }
 0x31c   : > { %v1023_v19 = vmul.f32 -1.442695, %v681_v17 }
 0x31d   : > { %v1072_v20 = vpop.f32.mrf.mxu1  ;;  %v1080_v21 = vpop.f32.mrf.mxu0 }
 0x31e   : > { %1181 = vpow2.f32 %v1023_v19 }
 0x327   : > { %v1180_v22 = vpop.eup %1179 }
 0x328   : > { %v748_v23 = vadd.f32 1.0, %v1180_v22 }
 0x32a   : > { %1183 = vrcp.f32 %v748_v23 }
 0x32b   : > { %v1182_v7 = vpop.eup %1181 }
 0x32c   : > { %v749_v24 = vadd.f32 1.0, %v1182_v7 }
 0x32e   : > { %1185 = vrcp.f32 %v749_v24 }
 0x337   : > { %v1184_v25 = vpop.eup %1183 }
 0x338   : > { %v754_v26 = vmul.f32 %v1184_v25, %v678_v12 }
 0x33a   : > { %v756_v29 = vmul.f32 %v754_v26, %v735_v13 }
 0x33b   : > { %v1186_v27 = vpop.eup %1185 }
 0x33c   : > { %v755_v28 = vmul.f32 %v1186_v27, %v681_v17 }
 0x33e   : > { %v757_v30 = vmul.f32 %v755_v28, %v738_v18 }
 0x340   : > { %v758_v31 = vpack.c.bf16 %v757_v30, %v756_v29 }
 0x342   : > { %1090 = vmatmul.mubr.msk.bf16.vlgmr.msra.gmra.mxu1 %vm793_vm3, %v758_v31 }
 0x402   : > { %v831_v33 = vpop.f32.mrf.mxu1 }
 0x403   : > { %v838_v34 = vadd.f32 %v831_v33, %v759_v32 }
 0x404   : > { %v1091_v35 = vpop.f32.mrf.mxu1 }
 0x405   : > { %840 = vst.msk [vmem:[#allocation3] sm:$0xff] %vm433_vm0, %v838_v34 }
 0x406   : > { %v834_v37 = vpop.f32.mrf.mxu1 }
 0x407   : > { %v839_v38 = vadd.f32 %v834_v37, %v760_v36 }
 0x408   : > { %v1092_v39 = vpop.f32.mrf.mxu1 }
 0x409   : > { %841 = vst.msk [vmem:[#allocation3 + $0x8] sm:$0xff] %vm433_vm0, %v839_v38 }
 0x40c   : > { %v847_v40 = vld [vmem:[#allocation3] sm:$0xff] }
 0x40d   : > { %v849_v41 = vadd.f32 %v847_v40, %v1435_v47 }
 0x40f   : > { %851 = vst.msk [vmem:[%s396_s29] sm:$0xff] %vm433_vm0, %v849_v41 }
 0x410   : > { %v848_v42 = vld [vmem:[#allocation3 + $0x8] sm:$0xff] }
 0x411   : > { %v850_v43 = vadd.f32 %v848_v42, %v1440_v50 }
 0x413   : > { %852 = vst.msk [vmem:[%s396_s29 + $0x8] sm:$0xff] %vm433_vm0, %v850_v43 }
 0x414   : > { %1200 = shalt.err (!%p1197_p5)
}
 0x415   : > { %s1201_s26 = scalar_lea.hbm %s1493_s16, 256  ;;  %s1205_s24 = scalar_lea.hbm %s1553_s9, 512 }
 0x416   : > { %p1202_p6 = scmp.ne.s32.totalorder %s1493_s16, %s1201_s26  ;;  %p1206_p10 = scmp.lt.s32.totalorder %s1493_s16, %s1553_s9 }
 0x417   : > { %p1207_p11 = scmp.lt.s32.totalorder %s1205_s24, %s1201_s26 }
 0x418   : > { %p1203_p7 = pnand %p1202_p6, %p1360_p4 }
 0x419   : > { %p1208_p12 = por %p1207_p11, %p1206_p10 }
 0x41a   : > { %p1204_p9 = pneg %p1203_p7 }
 0x41c   : > { %p1209_p13 = pnand %p1208_p12, %p1204_p9 }
 0x41e   : > { %1212 = shalt.err (!%p1209_p13)
}
 0x41f   : > { %s1268_s18 = smov 128   ;;  %s1269_s25 = smov 8  }
 0x420   : > { %1093 = dma.vmem_to_hbm [thread:$0]  (%p1360_p4), %s1495_s23, 256, %s1493_s16, %s1499_s12, %s1268_s18, %s1268_s18, %s1269_s25  }
 0x421 PF: > { %p1099_p0 = scmp.ge.s32.totalorder %s1263_s14, 2  ;;  %s882_s27 = sand.u32 1, %s1243_s30  }
 0x422   : > { %s883_s26 = scalar_lea.sflag [#allocation5], %s882_s27 }
 0x423   : > { %p1096_p1 = pnand %p1099_p0, %p1367_p8 }
 0x425   : > { %p1097_p2 = pneg %p1096_p1 }
 0x427   : > { %1238 = dma.done.wait (%p1097_p2), %s883_s26, 256  }
 0x428   : > { %1240 = vsyncadd (%p1097_p2), %s883_s26, 4294967040  ;;  %s22_s14 = sadd.s32 1, %s1263_s14   ;;  %s1556_s30 = smov %s1247_s10 }
 0x429   : > { %p19_p3 = scmp.ge.s32.totalorder %s22_s14, 4   ;;  %s1557_s10 = smov %s1251_s11 }
 0x42a   : > { %s1558_s11 = smov %s1373_s22  ;;  %s1559_s12 = smov %s1259_s13 }
 0x42b   : > { %s1560_s13 = smov %s1562_s17  ;;  %21 = sbr.rel (!%p19_p3) target bundleno = 4 (0x4), region = 111 }
 0x430   :  { %888 = vsyncpa [#allocation5], 1 }
 0x431   :  { %890 = vsyncpa [#allocation5 + $0x1], 1 }

</bundles_post_ra>
